<compile_context>
chip_gen: v5e
topology: v5e:2x2
jax: 0.10.0
libtpu: 0.0.40
codegen_flags: <defaults>
</compile_context>

<pallas_src>
import math

import jax
import jax.numpy as jnp
import numpy as np
from jax import lax
from jax.experimental import pallas as pl
from jax.experimental.pallas import tpu as pltpu


# ----------------------------- config -------------------------------------
B = 2
L = 8
D_MODEL = 32
D_INNER = 64           # expand = 2
D_STATE = 16
D_CONV = 4
DT_RANK = 2            # ~ d_model // 16
DT_MIN, DT_MAX, DT_INIT_FLOOR = 1e-3, 1e-1, 1e-4

DIB = B * D_INNER      # 128 lanes: batch stacked along lanes for the scan


# ----------------------------- kernel --------------------------------------
def mamba_block_kernel(x_ref,        # (B*L, d_model)           token-stacked
                       w_in_x_ref,   # (d_model, d_inner)        in_proj, x half
                       w_in_z_ref,   # (d_model, d_inner)        in_proj, z half
                       conv_w_ref,   # (d_conv, d_inner)
                       conv_b_ref,   # (1, d_inner)
                       w_dx_ref,     # (d_inner, d_inner)        x_proj delta cols @ dt_proj (folded)
                       w_b_ref,      # (d_inner, d_state)        x_proj B columns
                       w_c_ref,      # (d_inner, d_state)        x_proj C columns
                       dt_b_ref,     # (1, d_inner)
                       a_log_ref,    # (d_state, B*d_inner)      A_log.T tiled per batch
                       d_ref,        # (1, B*d_inner)            D tiled per batch
                       w_out_ref,    # (B*d_inner, B*d_model)    block-diag out_proj
                       o_ref,        # (L, B*d_model)            lane-stacked output
                       y_ref):       # VMEM scratch (L, B*d_inner)
    f32 = jnp.float32
    x = x_ref[...]                                                 # (16, 32)

    # ---- in_proj: two dots, no lane slicing of a fused result --------------
    x_in = jnp.dot(x, w_in_x_ref[...], preferred_element_type=f32)  # (16, 64)
    z    = jnp.dot(x, w_in_z_ref[...], preferred_element_type=f32)  # (16, 64)

    # ---- depthwise causal conv1d (padding = d_conv - 1, keep first L) ------
    # Row r = b*L + t of the fused batch.  Tap k reads x[t - (d_conv-1-k)];
    # pltpu.roll shifts rows down by s (XLU sublane rotate) and the (t >= s)
    # mask supplies both the causal zero padding and the batch boundary.
    cw = conv_w_ref[...]                                           # read once
    row = lax.broadcasted_iota(jnp.int32, (B * L, 1), 0)
    t_in_seq = row % L                                             # computed once
    acc = cw[D_CONV - 1:D_CONV, :] * x_in                          # tap k = d_conv-1
    for k in range(D_CONV - 1):                                    # static unroll
        s = D_CONV - 1 - k
        shifted = pltpu.roll(x_in, shift=s, axis=0)
        shifted = jnp.where(t_in_seq >= s, shifted, 0.0)
        acc = acc + cw[k:k + 1, :] * shifted
    x_c = acc + conv_b_ref[...]
    x_s = x_c * jax.nn.sigmoid(x_c)                                # SiLU, (16, 64)

    # ---- x_proj (+ folded dt_proj): three dots, no column extraction -------
    delta = jax.nn.softplus(
        jnp.dot(x_s, w_dx_ref[...], preferred_element_type=f32) + dt_b_ref[...])  # (16, 64)
    bmat = jnp.dot(x_s, w_b_ref[...], preferred_element_type=f32)  # (16, 16)
    cmat = jnp.dot(x_s, w_c_ref[...], preferred_element_type=f32)  # (16, 16)

    # ---- transition: stack batch along the lane axis (full 128-lane vregs) -
    # Row halves [:L] / [L:] are sublane-tile aligned, so these concats are
    # cheap half-vreg placements.
    xs_ls = jnp.concatenate([x_s[:L], x_s[L:]], axis=1)            # (8, 128)
    z_ls  = jnp.concatenate([z[:L],   z[L:]],   axis=1)            # (8, 128)
    dl_ls = jnp.concatenate([delta[:L], delta[L:]], axis=1)        # (8, 128)

    # B / C broadcast per 64-lane batch block: value B[t,b,s] replicated over
    # the d_inner lanes of its own batch block.
    b_bc = jnp.concatenate(
        [jnp.broadcast_to(bmat[:L][:, :, None], (L, D_STATE, D_INNER)),
         jnp.broadcast_to(bmat[L:][:, :, None], (L, D_STATE, D_INNER))],
        axis=2)                                                    # (8, 16, 128)
    c_bc = jnp.concatenate(
        [jnp.broadcast_to(cmat[:L][:, :, None], (L, D_STATE, D_INNER)),
         jnp.broadcast_to(cmat[L:][:, :, None], (L, D_STATE, D_INNER))],
        axis=2)                                                    # (8, 16, 128)

    # ---- precompute scan operands on full-lane slabs ------------------------
    a_t = -jnp.exp(a_log_ref[...])                                 # (16, 128)
    dA_all = jnp.exp(dl_ls[:, None, :] * a_t[None, :, :])          # (8, 16, 128)
    bx_all = (dl_ls * xs_ls)[:, None, :] * b_bc                    # (8, 16, 128)

    # ---- sequential selective scan over L (both batches at once) -----------
    # Per-t output row goes straight into the VMEM scratch (no stack/reshape).
    h = jnp.zeros((D_STATE, DIB), f32)                             # (16, 128)
    for t in range(L):                                             # static unroll
        h = dA_all[t] * h + bx_all[t]
        y_ref[pl.ds(t, 1), :] = jnp.sum(h * c_bc[t], axis=0, keepdims=True)

    # ---- epilogue (stays lane-stacked) --------------------------------------
    y_ls = y_ref[...] + d_ref[...] * xs_ls                         # (8, 128)
    gated = y_ls * (z_ls * jax.nn.sigmoid(z_ls))                   # y * SiLU(z)
    # Block-diagonal out_proj keeps the two batch blocks separate:
    # cols [b*d_model:(b+1)*d_model] of the result belong to batch b.
    o_ref[...] = jnp.dot(gated, w_out_ref[...], preferred_element_type=f32)  # (8, 64)


# ----------------------------- wrapper --------------------------------------
def _whole(shape):
    nd = len(shape)
    return pl.BlockSpec(shape, lambda i, _nd=nd: (0,) * _nd)


def mamba_block_forward(x, p):
    Bsz, Lseq, dm = x.shape

    # Host-side weight prep: transposes / splits / dt_proj fold / batch tiling.
    w_in_t = p["w_in"].T                                   # (d_model, 2*d_inner)
    w_in_x = w_in_t[:, :D_INNER]
    w_in_z = w_in_t[:, D_INNER:]

    w_x_t = p["w_x"].T                                     # (d_inner, dt_rank + 2*d_state)
    w_dx = w_x_t[:, :DT_RANK] @ p["w_dt"].T                # dt_proj folded: (d_inner, d_inner)
    w_b = w_x_t[:, DT_RANK:DT_RANK + D_STATE]              # (d_inner, d_state)
    w_c = w_x_t[:, DT_RANK + D_STATE:]                     # (d_inner, d_state)

    a_log_tiled = jnp.tile(p["A_log"].T, (1, Bsz))         # (d_state, B*d_inner)
    d_tiled = jnp.tile(p["D"].reshape(1, -1), (1, Bsz))    # (1, B*d_inner)

    w_out_t = p["w_out"].T                                 # (d_inner, d_model)
    w_out_bd = jnp.zeros((Bsz * D_INNER, Bsz * dm), jnp.float32)
    for b in range(Bsz):                                   # block-diagonal out_proj
        w_out_bd = w_out_bd.at[b * D_INNER:(b + 1) * D_INNER,
                               b * dm:(b + 1) * dm].set(w_out_t)

    weights = (
        w_in_x, w_in_z,
        p["conv_w"].T,                     # (d_conv, d_inner)
        p["conv_b"].reshape(1, -1),        # (1, d_inner)
        w_dx, w_b, w_c,
        p["dt_bias"].reshape(1, -1),       # (1, d_inner)
        a_log_tiled, d_tiled, w_out_bd,
    )

    x2 = x.reshape(Bsz * Lseq, dm)                         # batch fused into rows
    in_specs = [_whole(x2.shape)] + [_whole(w.shape) for w in weights]

    # Single fused grid step: best for v5e/v6e single-TC at these sizes.
    # TODO(synk): at real B*L, tile the token dim with a BlockSpec grid so
    # input DMAs pipeline with compute; on v7x mark a batch axis "parallel".
    out = pl.pallas_call(
        mamba_block_kernel,
        out_shape=jax.ShapeDtypeStruct((Lseq, Bsz * dm), jnp.float32),
        grid=(1,),
        in_specs=in_specs,
        out_specs=_whole((Lseq, Bsz * dm)),
        scratch_shapes=[pltpu.VMEM((Lseq, Bsz * D_INNER), jnp.float32)],
        compiler_params=pltpu.CompilerParams(
            dimension_semantics=("arbitrary",)),
    )(x2, *weights)
    # Kernel output is lane-stacked (L, B*d_model); undo on the host (cheap XLA).
    return jnp.transpose(out.reshape(Lseq, Bsz, dm), (1, 0, 2))


# ----------------------------- reference (plain JAX) ------------------------
def mamba_block_reference(x, p):
    Bsz, Lseq, _ = x.shape
    xz = x @ p["w_in"].T
    x_i, z = jnp.split(xz, 2, axis=-1)
    xt = jnp.pad(x_i, ((0, 0), (D_CONV - 1, 0), (0, 0)))
    conv = jnp.zeros_like(x_i)
    for k in range(D_CONV):
        conv = conv + p["conv_w"][:, k][None, None, :] * xt[:, k:k + Lseq, :]
    conv = conv + p["conv_b"][None, None, :]
    xs = jax.nn.silu(conv)
    dbc = xs @ p["w_x"].T
    dr = dbc[..., :DT_RANK]
    Bm = dbc[..., DT_RANK:DT_RANK + D_STATE]
    Cm = dbc[..., DT_RANK + D_STATE:]
    delta = jax.nn.softplus(dr @ p["w_dt"].T + p["dt_bias"])
    A = -jnp.exp(p["A_log"])                                   # (d_inner, d_state)
    deltaA = jnp.exp(delta[..., None] * A)                     # (B,L,d_inner,d_state)
    BX = delta[..., None] * Bm[:, :, None, :] * xs[..., None]
    h = jnp.zeros((Bsz, D_INNER, D_STATE))
    ys = []
    for t in range(Lseq):
        h = deltaA[:, t] * h + BX[:, t]
        ys.append(jnp.einsum("bds,bs->bd", h, Cm[:, t]))
    y = jnp.stack(ys, axis=1)
    y = y + p["D"][None, None, :] * xs
    out = (y * jax.nn.silu(z)) @ p["w_out"].T
    return out


# ----------------------------- params ---------------------------------------
def init_params(key):
    ks = jax.random.split(key, 7)
    dt_init_std = DT_RANK ** -0.5
    w_in = jax.random.normal(ks[0], (2 * D_INNER, D_MODEL), jnp.float32) / math.sqrt(D_MODEL)
    conv_w = jax.random.normal(ks[1], (D_INNER, D_CONV), jnp.float32) / math.sqrt(D_CONV)
    conv_b = 0.1 * jax.random.normal(ks[2], (D_INNER,), jnp.float32)
    w_x = jax.random.normal(ks[3], (DT_RANK + 2 * D_STATE, D_INNER), jnp.float32) / math.sqrt(D_INNER)
    w_dt = jax.random.uniform(ks[4], (D_INNER, DT_RANK), jnp.float32,
                              minval=-dt_init_std, maxval=dt_init_std)
    dt = jnp.exp(jax.random.uniform(ks[5], (D_INNER,), jnp.float32)
                 * (math.log(DT_MAX) - math.log(DT_MIN)) + math.log(DT_MIN))
    dt = jnp.clip(dt, DT_INIT_FLOOR, None)
    dt_bias = dt + jnp.log(-jnp.expm1(-dt))                    # inverse-softplus of dt
    A_log = jnp.log(jnp.tile(jnp.arange(1, D_STATE + 1, dtype=jnp.float32), (D_INNER, 1)))
    Dp = jnp.ones((D_INNER,), jnp.float32)
    w_out = jax.random.normal(ks[6], (D_MODEL, D_INNER), jnp.float32) / math.sqrt(D_INNER)
    # bias=False for in_proj / out_proj (config.bias default), conv_bias=True.
    return dict(w_in=w_in, conv_w=conv_w, conv_b=conv_b, w_x=w_x, w_dt=w_dt,
                dt_bias=dt_bias, A_log=A_log, D=Dp, w_out=w_out)


# ----------------------------- main ------------------------------------------
if __name__ == "__main__":
    key = jax.random.PRNGKey(0)
    kx, kp = jax.random.split(key)
    x = jax.random.normal(kx, (B, L, D_MODEL), jnp.float32)
    params = init_params(kp)

    out = jax.block_until_ready(mamba_block_forward(x, params))
    ref = jax.block_until_ready(mamba_block_reference(x, params))

    np.testing.assert_allclose(np.asarray(out), np.asarray(ref), rtol=2e-3, atol=2e-3)
    print("KERNEL_OK")
</pallas_src>

<mosaic_0001>
module attributes {stable_mosaic.version = 11 : i64} {
  func.func @mamba_block_kernel(%arg0: i32, %arg1: memref<16x32xf32, #tpu.memory_space<vmem>>, %arg2: memref<32x64xf32, #tpu.memory_space<vmem>>, %arg3: memref<32x64xf32, #tpu.memory_space<vmem>>, %arg4: memref<4x64xf32, #tpu.memory_space<vmem>>, %arg5: memref<1x64xf32, #tpu.memory_space<vmem>>, %arg6: memref<64x64xf32, #tpu.memory_space<vmem>>, %arg7: memref<64x16xf32, #tpu.memory_space<vmem>>, %arg8: memref<64x16xf32, #tpu.memory_space<vmem>>, %arg9: memref<1x64xf32, #tpu.memory_space<vmem>>, %arg10: memref<16x128xf32, #tpu.memory_space<vmem>>, %arg11: memref<1x128xf32, #tpu.memory_space<vmem>>, %arg12: memref<128x64xf32, #tpu.memory_space<vmem>>, %arg13: memref<8x64xf32, #tpu.memory_space<vmem>>, %arg14: memref<8x128xf32, #tpu.memory_space<vmem>>) attributes {dimension_semantics = [#tpu.dimension_semantics<arbitrary>], iteration_bounds = array<i64: 1>, scalar_prefetch = 0 : i64, scratch_operands = 1 : i64, tpu.core_type = #tpu.core_type<tc>, window_params = [{pipeline_mode = #tpu.pipeline_mode<synchronous>, transform_indices = @transform_0, window_bounds = array<i64: 16, 32>}, {pipeline_mode = #tpu.pipeline_mode<synchronous>, transform_indices = @transform_1, window_bounds = array<i64: 32, 64>}, {pipeline_mode = #tpu.pipeline_mode<synchronous>, transform_indices = @transform_2, window_bounds = array<i64: 32, 64>}, {pipeline_mode = #tpu.pipeline_mode<synchronous>, transform_indices = @transform_3, window_bounds = array<i64: 4, 64>}, {pipeline_mode = #tpu.pipeline_mode<synchronous>, transform_indices = @transform_4, window_bounds = array<i64: 1, 64>}, {pipeline_mode = #tpu.pipeline_mode<synchronous>, transform_indices = @transform_5, window_bounds = array<i64: 64, 64>}, {pipeline_mode = #tpu.pipeline_mode<synchronous>, transform_indices = @transform_6, window_bounds = array<i64: 64, 16>}, {pipeline_mode = #tpu.pipeline_mode<synchronous>, transform_indices = @transform_7, window_bounds = array<i64: 64, 16>}, {pipeline_mode = #tpu.pipeline_mode<synchronous>, transform_indices = @transform_8, window_bounds = array<i64: 1, 64>}, {pipeline_mode = #tpu.pipeline_mode<synchronous>, transform_indices = @transform_9, window_bounds = array<i64: 16, 128>}, {pipeline_mode = #tpu.pipeline_mode<synchronous>, transform_indices = @transform_10, window_bounds = array<i64: 1, 128>}, {pipeline_mode = #tpu.pipeline_mode<synchronous>, transform_indices = @transform_11, window_bounds = array<i64: 128, 64>}, {pipeline_mode = #tpu.pipeline_mode<synchronous>, transform_indices = @transform_12, window_bounds = array<i64: 8, 64>}]} {
    %c0 = arith.constant 0 : index
    %c0_0 = arith.constant 0 : index
    %0 = vector.load %arg1[%c0, %c0_0] : memref<16x32xf32, #tpu.memory_space<vmem>>, vector<16x32xf32>
    %c0_1 = arith.constant 0 : index
    %c0_2 = arith.constant 0 : index
    %1 = vector.load %arg2[%c0_1, %c0_2] : memref<32x64xf32, #tpu.memory_space<vmem>>, vector<32x64xf32>
    %cst = arith.constant dense<0.000000e+00> : vector<16x64xf32>
    %2 = tpu.matmul %0, %1, %cst {dimension_numbers = #tpu.dot_dimension_numbers<[1], [0], [0], [1], [0, 0, 1, 1], [], []>} : vector<16x32xf32>, vector<32x64xf32>, vector<16x64xf32> -> vector<16x64xf32>
    %c0_3 = arith.constant 0 : index
    %c0_4 = arith.constant 0 : index
    %3 = vector.load %arg3[%c0_3, %c0_4] : memref<32x64xf32, #tpu.memory_space<vmem>>, vector<32x64xf32>
    %cst_5 = arith.constant dense<0.000000e+00> : vector<16x64xf32>
    %4 = tpu.matmul %0, %3, %cst_5 {dimension_numbers = #tpu.dot_dimension_numbers<[1], [0], [0], [1], [0, 0, 1, 1], [], []>} : vector<16x32xf32>, vector<32x64xf32>, vector<16x64xf32> -> vector<16x64xf32>
    %c0_6 = arith.constant 0 : index
    %c0_7 = arith.constant 0 : index
    %5 = vector.load %arg4[%c0_6, %c0_7] : memref<4x64xf32, #tpu.memory_space<vmem>>, vector<4x64xf32>
    %6 = tpu.iota {dimensions = array<i32: 0>} : vector<16x1xi32>
    %c8_i32 = arith.constant 8 : i32
    %c0_i32 = arith.constant 0 : i32
    %7 = arith.cmpi eq, %c8_i32, %c0_i32 : i32
    %c1_i32 = arith.constant 1 : i32
    %8 = arith.select %7, %c1_i32, %c8_i32 : i32
    %9 = vector.broadcast %8 : i32 to vector<16x1xi32>
    %10 = arith.remsi %6, %9 : vector<16x1xi32>
    %c0_i32_8 = arith.constant 0 : i32
    %11 = vector.broadcast %c0_i32_8 : i32 to vector<16x1xi32>
    %12 = arith.cmpi ne, %10, %11 : vector<16x1xi32>
    %c0_i32_9 = arith.constant 0 : i32
    %13 = vector.broadcast %c0_i32_9 : i32 to vector<16x1xi32>
    %14 = arith.cmpi slt, %10, %13 : vector<16x1xi32>
    %c0_i32_10 = arith.constant 0 : i32
    %15 = arith.cmpi slt, %8, %c0_i32_10 : i32
    %16 = vector.broadcast %15 : i1 to vector<16x1xi1>
    %17 = vector.broadcast %16 : vector<16x1xi1> to vector<16x1xi1>
    %18 = arith.xori %14, %17 : vector<16x1xi1>
    %19 = arith.andi %18, %12 : vector<16x1xi1>
    %20 = vector.broadcast %8 : i32 to vector<16x1xi32>
    %21 = arith.addi %10, %20 : vector<16x1xi32>
    %22 = arith.select %19, %21, %10 : vector<16x1xi1>, vector<16x1xi32>
    %23 = vector.extract_strided_slice %5 {offsets = [3, 0], sizes = [1, 64], strides = [1, 1]} : vector<4x64xf32> to vector<1x64xf32>
    %24 = vector.broadcast %23 : vector<1x64xf32> to vector<16x64xf32>
    %25 = arith.mulf %24, %2 : vector<16x64xf32>
    %c3_i32 = arith.constant 3 : i32
    %26 = tpu.dynamic_rotate %2 by %c3_i32 dim 0 : vector<16x64xf32>, i32 -> vector<16x64xf32>
    %c3_i32_11 = arith.constant 3 : i32
    %27 = vector.broadcast %c3_i32_11 : i32 to vector<16x1xi32>
    %28 = arith.cmpi sge, %22, %27 : vector<16x1xi32>
    %cst_12 = arith.constant 0.000000e+00 : f32
    %29 = vector.shape_cast %28 : vector<16x1xi1> to vector<16x1xi1>
    %30 = vector.broadcast %29 : vector<16x1xi1> to vector<16x64xi1>
    %31 = vector.broadcast %cst_12 : f32 to vector<16x64xf32>
    %32 = arith.select %30, %26, %31 : vector<16x64xi1>, vector<16x64xf32>
    %33 = vector.extract_strided_slice %5 {offsets = [0, 0], sizes = [1, 64], strides = [1, 1]} : vector<4x64xf32> to vector<1x64xf32>
    %34 = vector.broadcast %33 : vector<1x64xf32> to vector<16x64xf32>
    %35 = arith.mulf %34, %32 : vector<16x64xf32>
    %36 = arith.addf %25, %35 : vector<16x64xf32>
    %c2_i32 = arith.constant 2 : i32
    %37 = tpu.dynamic_rotate %2 by %c2_i32 dim 0 : vector<16x64xf32>, i32 -> vector<16x64xf32>
    %c2_i32_13 = arith.constant 2 : i32
    %38 = vector.broadcast %c2_i32_13 : i32 to vector<16x1xi32>
    %39 = arith.cmpi sge, %22, %38 : vector<16x1xi32>
    %cst_14 = arith.constant 0.000000e+00 : f32
    %40 = vector.shape_cast %39 : vector<16x1xi1> to vector<16x1xi1>
    %41 = vector.broadcast %40 : vector<16x1xi1> to vector<16x64xi1>
    %42 = vector.broadcast %cst_14 : f32 to vector<16x64xf32>
    %43 = arith.select %41, %37, %42 : vector<16x64xi1>, vector<16x64xf32>
    %44 = vector.extract_strided_slice %5 {offsets = [1, 0], sizes = [1, 64], strides = [1, 1]} : vector<4x64xf32> to vector<1x64xf32>
    %45 = vector.broadcast %44 : vector<1x64xf32> to vector<16x64xf32>
    %46 = arith.mulf %45, %43 : vector<16x64xf32>
    %47 = arith.addf %36, %46 : vector<16x64xf32>
    %c1_i32_15 = arith.constant 1 : i32
    %48 = tpu.dynamic_rotate %2 by %c1_i32_15 dim 0 : vector<16x64xf32>, i32 -> vector<16x64xf32>
    %c1_i32_16 = arith.constant 1 : i32
    %49 = vector.broadcast %c1_i32_16 : i32 to vector<16x1xi32>
    %50 = arith.cmpi sge, %22, %49 : vector<16x1xi32>
    %cst_17 = arith.constant 0.000000e+00 : f32
    %51 = vector.shape_cast %50 : vector<16x1xi1> to vector<16x1xi1>
    %52 = vector.broadcast %51 : vector<16x1xi1> to vector<16x64xi1>
    %53 = vector.broadcast %cst_17 : f32 to vector<16x64xf32>
    %54 = arith.select %52, %48, %53 : vector<16x64xi1>, vector<16x64xf32>
    %55 = vector.extract_strided_slice %5 {offsets = [2, 0], sizes = [1, 64], strides = [1, 1]} : vector<4x64xf32> to vector<1x64xf32>
    %56 = vector.broadcast %55 : vector<1x64xf32> to vector<16x64xf32>
    %57 = arith.mulf %56, %54 : vector<16x64xf32>
    %58 = arith.addf %47, %57 : vector<16x64xf32>
    %c0_18 = arith.constant 0 : index
    %c0_19 = arith.constant 0 : index
    %59 = vector.load %arg5[%c0_18, %c0_19] : memref<1x64xf32, #tpu.memory_space<vmem>>, vector<1x64xf32>
    %60 = vector.broadcast %59 : vector<1x64xf32> to vector<16x64xf32>
    %61 = arith.addf %58, %60 : vector<16x64xf32>
    %62 = arith.negf %61 : vector<16x64xf32>
    %63 = math.exp %62 : vector<16x64xf32>
    %cst_20 = arith.constant 1.000000e+00 : f32
    %64 = vector.broadcast %cst_20 : f32 to vector<16x64xf32>
    %65 = arith.addf %64, %63 : vector<16x64xf32>
    %66 = arith.divf %64, %65 : vector<16x64xf32>
    %67 = arith.mulf %61, %66 : vector<16x64xf32>
    %c0_21 = arith.constant 0 : index
    %c0_22 = arith.constant 0 : index
    %68 = vector.load %arg6[%c0_21, %c0_22] : memref<64x64xf32, #tpu.memory_space<vmem>>, vector<64x64xf32>
    %cst_23 = arith.constant dense<0.000000e+00> : vector<16x64xf32>
    %69 = tpu.matmul %67, %68, %cst_23 {dimension_numbers = #tpu.dot_dimension_numbers<[1], [0], [0], [1], [0, 0, 1, 1], [], []>} : vector<16x64xf32>, vector<64x64xf32>, vector<16x64xf32> -> vector<16x64xf32>
    %c0_24 = arith.constant 0 : index
    %c0_25 = arith.constant 0 : index
    %70 = vector.load %arg9[%c0_24, %c0_25] : memref<1x64xf32, #tpu.memory_space<vmem>>, vector<1x64xf32>
    %71 = vector.broadcast %70 : vector<1x64xf32> to vector<16x64xf32>
    %72 = arith.addf %69, %71 : vector<16x64xf32>
    %cst_26 = arith.constant 0.000000e+00 : f32
    %73 = vector.broadcast %cst_26 : f32 to vector<16x64xf32>
    %74 = arith.maximumf %72, %73 : vector<16x64xf32>
    %75 = vector.broadcast %cst_26 : f32 to vector<16x64xf32>
    %76 = arith.subf %72, %75 : vector<16x64xf32>
    %77 = arith.cmpf one, %76, %76 : vector<16x64xf32>
    %78 = vector.broadcast %cst_26 : f32 to vector<16x64xf32>
    %79 = arith.addf %72, %78 : vector<16x64xf32>
    %80 = math.absf %76 : vector<16x64xf32>
    %cst_27 = arith.constant 0.000000e+00 : f32
    %81 = vector.broadcast %cst_27 : f32 to vector<16x64xf32>
    %82 = arith.subf %81, %80 : vector<16x64xf32>
    %83 = math.exp %82 : vector<16x64xf32>
    %84 = math.log1p %83 : vector<16x64xf32>
    %85 = arith.addf %74, %84 : vector<16x64xf32>
    %86 = arith.select %77, %79, %85 : vector<16x64xi1>, vector<16x64xf32>
    %c0_28 = arith.constant 0 : index
    %c0_29 = arith.constant 0 : index
    %87 = vector.load %arg7[%c0_28, %c0_29] : memref<64x16xf32, #tpu.memory_space<vmem>>, vector<64x16xf32>
    %cst_30 = arith.constant dense<0.000000e+00> : vector<16x16xf32>
    %88 = tpu.matmul %67, %87, %cst_30 {dimension_numbers = #tpu.dot_dimension_numbers<[1], [0], [0], [1], [0, 0, 1, 1], [], []>} : vector<16x64xf32>, vector<64x16xf32>, vector<16x16xf32> -> vector<16x16xf32>
    %c0_31 = arith.constant 0 : index
    %c0_32 = arith.constant 0 : index
    %89 = vector.load %arg8[%c0_31, %c0_32] : memref<64x16xf32, #tpu.memory_space<vmem>>, vector<64x16xf32>
    %cst_33 = arith.constant dense<0.000000e+00> : vector<16x16xf32>
    %90 = tpu.matmul %67, %89, %cst_33 {dimension_numbers = #tpu.dot_dimension_numbers<[1], [0], [0], [1], [0, 0, 1, 1], [], []>} : vector<16x64xf32>, vector<64x16xf32>, vector<16x16xf32> -> vector<16x16xf32>
    %91 = vector.extract_strided_slice %67 {offsets = [0, 0], sizes = [8, 64], strides = [1, 1]} : vector<16x64xf32> to vector<8x64xf32>
    %92 = vector.extract_strided_slice %67 {offsets = [8, 0], sizes = [8, 64], strides = [1, 1]} : vector<16x64xf32> to vector<8x64xf32>
    %93 = tpu.concatenate %91, %92 in 1 : vector<8x64xf32>, vector<8x64xf32> -> vector<8x128xf32>
    %94 = vector.extract_strided_slice %4 {offsets = [0, 0], sizes = [8, 64], strides = [1, 1]} : vector<16x64xf32> to vector<8x64xf32>
    %95 = vector.extract_strided_slice %4 {offsets = [8, 0], sizes = [8, 64], strides = [1, 1]} : vector<16x64xf32> to vector<8x64xf32>
    %96 = tpu.concatenate %94, %95 in 1 : vector<8x64xf32>, vector<8x64xf32> -> vector<8x128xf32>
    %97 = vector.extract_strided_slice %86 {offsets = [0, 0], sizes = [8, 64], strides = [1, 1]} : vector<16x64xf32> to vector<8x64xf32>
    %98 = vector.extract_strided_slice %86 {offsets = [8, 0], sizes = [8, 64], strides = [1, 1]} : vector<16x64xf32> to vector<8x64xf32>
    %99 = tpu.concatenate %97, %98 in 1 : vector<8x64xf32>, vector<8x64xf32> -> vector<8x128xf32>
    %100 = vector.extract_strided_slice %88 {offsets = [0, 0], sizes = [8, 16], strides = [1, 1]} : vector<16x16xf32> to vector<8x16xf32>
    %101 = vector.shape_cast %100 : vector<8x16xf32> to vector<8x16x1xf32>
    %102 = vector.shape_cast %101 : vector<8x16x1xf32> to vector<8x16x1xf32>
    %103 = vector.broadcast %102 : vector<8x16x1xf32> to vector<8x16x64xf32>
    %104 = vector.extract_strided_slice %88 {offsets = [8, 0], sizes = [8, 16], strides = [1, 1]} : vector<16x16xf32> to vector<8x16xf32>
    %105 = vector.shape_cast %104 : vector<8x16xf32> to vector<8x16x1xf32>
    %106 = vector.shape_cast %105 : vector<8x16x1xf32> to vector<8x16x1xf32>
    %107 = vector.broadcast %106 : vector<8x16x1xf32> to vector<8x16x64xf32>
    %108 = tpu.concatenate %103, %107 in 2 : vector<8x16x64xf32>, vector<8x16x64xf32> -> vector<8x16x128xf32>
    %109 = vector.extract_strided_slice %90 {offsets = [0, 0], sizes = [8, 16], strides = [1, 1]} : vector<16x16xf32> to vector<8x16xf32>
    %110 = vector.shape_cast %109 : vector<8x16xf32> to vector<8x16x1xf32>
    %111 = vector.shape_cast %110 : vector<8x16x1xf32> to vector<8x16x1xf32>
    %112 = vector.broadcast %111 : vector<8x16x1xf32> to vector<8x16x64xf32>
    %113 = vector.extract_strided_slice %90 {offsets = [8, 0], sizes = [8, 16], strides = [1, 1]} : vector<16x16xf32> to vector<8x16xf32>
    %114 = vector.shape_cast %113 : vector<8x16xf32> to vector<8x16x1xf32>
    %115 = vector.shape_cast %114 : vector<8x16x1xf32> to vector<8x16x1xf32>
    %116 = vector.broadcast %115 : vector<8x16x1xf32> to vector<8x16x64xf32>
    %117 = tpu.concatenate %112, %116 in 2 : vector<8x16x64xf32>, vector<8x16x64xf32> -> vector<8x16x128xf32>
    %c0_34 = arith.constant 0 : index
    %c0_35 = arith.constant 0 : index
    %118 = vector.load %arg10[%c0_34, %c0_35] : memref<16x128xf32, #tpu.memory_space<vmem>>, vector<16x128xf32>
    %119 = math.exp %118 : vector<16x128xf32>
    %cst_36 = arith.constant 0.000000e+00 : f32
    %120 = vector.broadcast %cst_36 : f32 to vector<16x128xf32>
    %121 = arith.subf %120, %119 : vector<16x128xf32>
    %122 = vector.shape_cast %99 : vector<8x128xf32> to vector<8x1x128xf32>
    %123 = vector.shape_cast %121 : vector<16x128xf32> to vector<1x16x128xf32>
    %124 = vector.broadcast %122 : vector<8x1x128xf32> to vector<8x16x128xf32>
    %125 = vector.broadcast %123 : vector<1x16x128xf32> to vector<8x16x128xf32>
    %126 = arith.mulf %124, %125 : vector<8x16x128xf32>
    %127 = math.exp %126 : vector<8x16x128xf32>
    %128 = arith.mulf %99, %93 : vector<8x128xf32>
    %129 = vector.shape_cast %128 : vector<8x128xf32> to vector<8x1x128xf32>
    %130 = vector.broadcast %129 : vector<8x1x128xf32> to vector<8x16x128xf32>
    %131 = arith.mulf %130, %108 : vector<8x16x128xf32>
    %cst_37 = arith.constant 0.000000e+00 : f32
    %132 = vector.broadcast %cst_37 : f32 to vector<16x128xf32>
    %133 = vector.extract_strided_slice %127 {offsets = [0, 0, 0], sizes = [1, 16, 128], strides = [1, 1, 1]} : vector<8x16x128xf32> to vector<1x16x128xf32>
    %134 = vector.shape_cast %133 : vector<1x16x128xf32> to vector<16x128xf32>
    %135 = arith.mulf %134, %132 : vector<16x128xf32>
    %136 = vector.extract_strided_slice %131 {offsets = [0, 0, 0], sizes = [1, 16, 128], strides = [1, 1, 1]} : vector<8x16x128xf32> to vector<1x16x128xf32>
    %137 = vector.shape_cast %136 : vector<1x16x128xf32> to vector<16x128xf32>
    %138 = arith.addf %135, %137 : vector<16x128xf32>
    %139 = vector.extract_strided_slice %117 {offsets = [0, 0, 0], sizes = [1, 16, 128], strides = [1, 1, 1]} : vector<8x16x128xf32> to vector<1x16x128xf32>
    %140 = vector.shape_cast %139 : vector<1x16x128xf32> to vector<16x128xf32>
    %141 = arith.mulf %138, %140 : vector<16x128xf32>
    %cst_38 = arith.constant dense<0.000000e+00> : vector<128xf32>
    %142 = vector.multi_reduction <add>, %141, %cst_38 [0] : vector<16x128xf32> to vector<128xf32>
    %143 = vector.shape_cast %142 : vector<128xf32> to vector<1x128xf32>
    %c0_39 = arith.constant 0 : index
    %c0_40 = arith.constant 0 : index
    %144 = vector.load %arg14[%c0_39, %c0_40] : memref<8x128xf32, #tpu.memory_space<vmem>>, vector<1x128xf32>
    tpu.vector_store %arg14[%c0_39, %c0_40], %143 {strides = array<i32>} : memref<8x128xf32, #tpu.memory_space<vmem>>, vector<1x128xf32>,
    %145 = vector.extract_strided_slice %127 {offsets = [1, 0, 0], sizes = [1, 16, 128], strides = [1, 1, 1]} : vector<8x16x128xf32> to vector<1x16x128xf32>
    %146 = vector.shape_cast %145 : vector<1x16x128xf32> to vector<16x128xf32>
    %147 = arith.mulf %146, %138 : vector<16x128xf32>
    %148 = vector.extract_strided_slice %131 {offsets = [1, 0, 0], sizes = [1, 16, 128], strides = [1, 1, 1]} : vector<8x16x128xf32> to vector<1x16x128xf32>
    %149 = vector.shape_cast %148 : vector<1x16x128xf32> to vector<16x128xf32>
    %150 = arith.addf %147, %149 : vector<16x128xf32>
    %151 = vector.extract_strided_slice %117 {offsets = [1, 0, 0], sizes = [1, 16, 128], strides = [1, 1, 1]} : vector<8x16x128xf32> to vector<1x16x128xf32>
    %152 = vector.shape_cast %151 : vector<1x16x128xf32> to vector<16x128xf32>
    %153 = arith.mulf %150, %152 : vector<16x128xf32>
    %cst_41 = arith.constant dense<0.000000e+00> : vector<128xf32>
    %154 = vector.multi_reduction <add>, %153, %cst_41 [0] : vector<16x128xf32> to vector<128xf32>
    %155 = vector.shape_cast %154 : vector<128xf32> to vector<1x128xf32>
    %c1 = arith.constant 1 : index
    %c0_42 = arith.constant 0 : index
    %156 = vector.load %arg14[%c1, %c0_42] : memref<8x128xf32, #tpu.memory_space<vmem>>, vector<1x128xf32>
    tpu.vector_store %arg14[%c1, %c0_42], %155 {strides = array<i32>} : memref<8x128xf32, #tpu.memory_space<vmem>>, vector<1x128xf32>,
    %157 = vector.extract_strided_slice %127 {offsets = [2, 0, 0], sizes = [1, 16, 128], strides = [1, 1, 1]} : vector<8x16x128xf32> to vector<1x16x128xf32>
    %158 = vector.shape_cast %157 : vector<1x16x128xf32> to vector<16x128xf32>
    %159 = arith.mulf %158, %150 : vector<16x128xf32>
    %160 = vector.extract_strided_slice %131 {offsets = [2, 0, 0], sizes = [1, 16, 128], strides = [1, 1, 1]} : vector<8x16x128xf32> to vector<1x16x128xf32>
    %161 = vector.shape_cast %160 : vector<1x16x128xf32> to vector<16x128xf32>
    %162 = arith.addf %159, %161 : vector<16x128xf32>
    %163 = vector.extract_strided_slice %117 {offsets = [2, 0, 0], sizes = [1, 16, 128], strides = [1, 1, 1]} : vector<8x16x128xf32> to vector<1x16x128xf32>
    %164 = vector.shape_cast %163 : vector<1x16x128xf32> to vector<16x128xf32>
    %165 = arith.mulf %162, %164 : vector<16x128xf32>
    %cst_43 = arith.constant dense<0.000000e+00> : vector<128xf32>
    %166 = vector.multi_reduction <add>, %165, %cst_43 [0] : vector<16x128xf32> to vector<128xf32>
    %167 = vector.shape_cast %166 : vector<128xf32> to vector<1x128xf32>
    %c2 = arith.constant 2 : index
    %c0_44 = arith.constant 0 : index
    %168 = vector.load %arg14[%c2, %c0_44] : memref<8x128xf32, #tpu.memory_space<vmem>>, vector<1x128xf32>
    tpu.vector_store %arg14[%c2, %c0_44], %167 {strides = array<i32>} : memref<8x128xf32, #tpu.memory_space<vmem>>, vector<1x128xf32>,
    %169 = vector.extract_strided_slice %127 {offsets = [3, 0, 0], sizes = [1, 16, 128], strides = [1, 1, 1]} : vector<8x16x128xf32> to vector<1x16x128xf32>
    %170 = vector.shape_cast %169 : vector<1x16x128xf32> to vector<16x128xf32>
    %171 = arith.mulf %170, %162 : vector<16x128xf32>
    %172 = vector.extract_strided_slice %131 {offsets = [3, 0, 0], sizes = [1, 16, 128], strides = [1, 1, 1]} : vector<8x16x128xf32> to vector<1x16x128xf32>
    %173 = vector.shape_cast %172 : vector<1x16x128xf32> to vector<16x128xf32>
    %174 = arith.addf %171, %173 : vector<16x128xf32>
    %175 = vector.extract_strided_slice %117 {offsets = [3, 0, 0], sizes = [1, 16, 128], strides = [1, 1, 1]} : vector<8x16x128xf32> to vector<1x16x128xf32>
    %176 = vector.shape_cast %175 : vector<1x16x128xf32> to vector<16x128xf32>
    %177 = arith.mulf %174, %176 : vector<16x128xf32>
    %cst_45 = arith.constant dense<0.000000e+00> : vector<128xf32>
    %178 = vector.multi_reduction <add>, %177, %cst_45 [0] : vector<16x128xf32> to vector<128xf32>
    %179 = vector.shape_cast %178 : vector<128xf32> to vector<1x128xf32>
    %c3 = arith.constant 3 : index
    %c0_46 = arith.constant 0 : index
    %180 = vector.load %arg14[%c3, %c0_46] : memref<8x128xf32, #tpu.memory_space<vmem>>, vector<1x128xf32>
    tpu.vector_store %arg14[%c3, %c0_46], %179 {strides = array<i32>} : memref<8x128xf32, #tpu.memory_space<vmem>>, vector<1x128xf32>,
    %181 = vector.extract_strided_slice %127 {offsets = [4, 0, 0], sizes = [1, 16, 128], strides = [1, 1, 1]} : vector<8x16x128xf32> to vector<1x16x128xf32>
    %182 = vector.shape_cast %181 : vector<1x16x128xf32> to vector<16x128xf32>
    %183 = arith.mulf %182, %174 : vector<16x128xf32>
    %184 = vector.extract_strided_slice %131 {offsets = [4, 0, 0], sizes = [1, 16, 128], strides = [1, 1, 1]} : vector<8x16x128xf32> to vector<1x16x128xf32>
    %185 = vector.shape_cast %184 : vector<1x16x128xf32> to vector<16x128xf32>
    %186 = arith.addf %183, %185 : vector<16x128xf32>
    %187 = vector.extract_strided_slice %117 {offsets = [4, 0, 0], sizes = [1, 16, 128], strides = [1, 1, 1]} : vector<8x16x128xf32> to vector<1x16x128xf32>
    %188 = vector.shape_cast %187 : vector<1x16x128xf32> to vector<16x128xf32>
    %189 = arith.mulf %186, %188 : vector<16x128xf32>
    %cst_47 = arith.constant dense<0.000000e+00> : vector<128xf32>
    %190 = vector.multi_reduction <add>, %189, %cst_47 [0] : vector<16x128xf32> to vector<128xf32>
    %191 = vector.shape_cast %190 : vector<128xf32> to vector<1x128xf32>
    %c4 = arith.constant 4 : index
    %c0_48 = arith.constant 0 : index
    %192 = vector.load %arg14[%c4, %c0_48] : memref<8x128xf32, #tpu.memory_space<vmem>>, vector<1x128xf32>
    tpu.vector_store %arg14[%c4, %c0_48], %191 {strides = array<i32>} : memref<8x128xf32, #tpu.memory_space<vmem>>, vector<1x128xf32>,
    %193 = vector.extract_strided_slice %127 {offsets = [5, 0, 0], sizes = [1, 16, 128], strides = [1, 1, 1]} : vector<8x16x128xf32> to vector<1x16x128xf32>
    %194 = vector.shape_cast %193 : vector<1x16x128xf32> to vector<16x128xf32>
    %195 = arith.mulf %194, %186 : vector<16x128xf32>
    %196 = vector.extract_strided_slice %131 {offsets = [5, 0, 0], sizes = [1, 16, 128], strides = [1, 1, 1]} : vector<8x16x128xf32> to vector<1x16x128xf32>
    %197 = vector.shape_cast %196 : vector<1x16x128xf32> to vector<16x128xf32>
    %198 = arith.addf %195, %197 : vector<16x128xf32>
    %199 = vector.extract_strided_slice %117 {offsets = [5, 0, 0], sizes = [1, 16, 128], strides = [1, 1, 1]} : vector<8x16x128xf32> to vector<1x16x128xf32>
    %200 = vector.shape_cast %199 : vector<1x16x128xf32> to vector<16x128xf32>
    %201 = arith.mulf %198, %200 : vector<16x128xf32>
    %cst_49 = arith.constant dense<0.000000e+00> : vector<128xf32>
    %202 = vector.multi_reduction <add>, %201, %cst_49 [0] : vector<16x128xf32> to vector<128xf32>
    %203 = vector.shape_cast %202 : vector<128xf32> to vector<1x128xf32>
    %c5 = arith.constant 5 : index
    %c0_50 = arith.constant 0 : index
    %204 = vector.load %arg14[%c5, %c0_50] : memref<8x128xf32, #tpu.memory_space<vmem>>, vector<1x128xf32>
    tpu.vector_store %arg14[%c5, %c0_50], %203 {strides = array<i32>} : memref<8x128xf32, #tpu.memory_space<vmem>>, vector<1x128xf32>,
    %205 = vector.extract_strided_slice %127 {offsets = [6, 0, 0], sizes = [1, 16, 128], strides = [1, 1, 1]} : vector<8x16x128xf32> to vector<1x16x128xf32>
    %206 = vector.shape_cast %205 : vector<1x16x128xf32> to vector<16x128xf32>
    %207 = arith.mulf %206, %198 : vector<16x128xf32>
    %208 = vector.extract_strided_slice %131 {offsets = [6, 0, 0], sizes = [1, 16, 128], strides = [1, 1, 1]} : vector<8x16x128xf32> to vector<1x16x128xf32>
    %209 = vector.shape_cast %208 : vector<1x16x128xf32> to vector<16x128xf32>
    %210 = arith.addf %207, %209 : vector<16x128xf32>
    %211 = vector.extract_strided_slice %117 {offsets = [6, 0, 0], sizes = [1, 16, 128], strides = [1, 1, 1]} : vector<8x16x128xf32> to vector<1x16x128xf32>
    %212 = vector.shape_cast %211 : vector<1x16x128xf32> to vector<16x128xf32>
    %213 = arith.mulf %210, %212 : vector<16x128xf32>
    %cst_51 = arith.constant dense<0.000000e+00> : vector<128xf32>
    %214 = vector.multi_reduction <add>, %213, %cst_51 [0] : vector<16x128xf32> to vector<128xf32>
    %215 = vector.shape_cast %214 : vector<128xf32> to vector<1x128xf32>
    %c6 = arith.constant 6 : index
    %c0_52 = arith.constant 0 : index
    %216 = vector.load %arg14[%c6, %c0_52] : memref<8x128xf32, #tpu.memory_space<vmem>>, vector<1x128xf32>
    tpu.vector_store %arg14[%c6, %c0_52], %215 {strides = array<i32>} : memref<8x128xf32, #tpu.memory_space<vmem>>, vector<1x128xf32>,
    %217 = vector.extract_strided_slice %127 {offsets = [7, 0, 0], sizes = [1, 16, 128], strides = [1, 1, 1]} : vector<8x16x128xf32> to vector<1x16x128xf32>
    %218 = vector.shape_cast %217 : vector<1x16x128xf32> to vector<16x128xf32>
    %219 = arith.mulf %218, %210 : vector<16x128xf32>
    %220 = vector.extract_strided_slice %131 {offsets = [7, 0, 0], sizes = [1, 16, 128], strides = [1, 1, 1]} : vector<8x16x128xf32> to vector<1x16x128xf32>
    %221 = vector.shape_cast %220 : vector<1x16x128xf32> to vector<16x128xf32>
    %222 = arith.addf %219, %221 : vector<16x128xf32>
    %223 = vector.extract_strided_slice %117 {offsets = [7, 0, 0], sizes = [1, 16, 128], strides = [1, 1, 1]} : vector<8x16x128xf32> to vector<1x16x128xf32>
    %224 = vector.shape_cast %223 : vector<1x16x128xf32> to vector<16x128xf32>
    %225 = arith.mulf %222, %224 : vector<16x128xf32>
    %cst_53 = arith.constant dense<0.000000e+00> : vector<128xf32>
    %226 = vector.multi_reduction <add>, %225, %cst_53 [0] : vector<16x128xf32> to vector<128xf32>
    %227 = vector.shape_cast %226 : vector<128xf32> to vector<1x128xf32>
    %c7 = arith.constant 7 : index
    %c0_54 = arith.constant 0 : index
    %228 = vector.load %arg14[%c7, %c0_54] : memref<8x128xf32, #tpu.memory_space<vmem>>, vector<1x128xf32>
    tpu.vector_store %arg14[%c7, %c0_54], %227 {strides = array<i32>} : memref<8x128xf32, #tpu.memory_space<vmem>>, vector<1x128xf32>,
    %c0_55 = arith.constant 0 : index
    %c0_56 = arith.constant 0 : index
    %229 = vector.load %arg14[%c0_55, %c0_56] : memref<8x128xf32, #tpu.memory_space<vmem>>, vector<8x128xf32>
    %c0_57 = arith.constant 0 : index
    %c0_58 = arith.constant 0 : index
    %230 = vector.load %arg11[%c0_57, %c0_58] : memref<1x128xf32, #tpu.memory_space<vmem>>, vector<1x128xf32>
    %231 = vector.broadcast %230 : vector<1x128xf32> to vector<8x128xf32>
    %232 = arith.mulf %231, %93 : vector<8x128xf32>
    %233 = arith.addf %229, %232 : vector<8x128xf32>
    %234 = arith.negf %96 : vector<8x128xf32>
    %235 = math.exp %234 : vector<8x128xf32>
    %cst_59 = arith.constant 1.000000e+00 : f32
    %236 = vector.broadcast %cst_59 : f32 to vector<8x128xf32>
    %237 = arith.addf %236, %235 : vector<8x128xf32>
    %238 = arith.divf %236, %237 : vector<8x128xf32>
    %239 = arith.mulf %96, %238 : vector<8x128xf32>
    %240 = arith.mulf %233, %239 : vector<8x128xf32>
    %c0_60 = arith.constant 0 : index
    %c0_61 = arith.constant 0 : index
    %241 = vector.load %arg12[%c0_60, %c0_61] : memref<128x64xf32, #tpu.memory_space<vmem>>, vector<128x64xf32>
    %cst_62 = arith.constant dense<0.000000e+00> : vector<8x64xf32>
    %242 = tpu.matmul %240, %241, %cst_62 {dimension_numbers = #tpu.dot_dimension_numbers<[1], [0], [0], [1], [0, 0, 1, 1], [], []>} : vector<8x128xf32>, vector<128x64xf32>, vector<8x64xf32> -> vector<8x64xf32>
    %c0_63 = arith.constant 0 : index
    %c0_64 = arith.constant 0 : index
    %243 = vector.load %arg13[%c0_63, %c0_64] : memref<8x64xf32, #tpu.memory_space<vmem>>, vector<8x64xf32>
    tpu.vector_store %arg13[%c0_63, %c0_64], %242 {strides = array<i32>} : memref<8x64xf32, #tpu.memory_space<vmem>>, vector<8x64xf32>,
    return
  }
  func.func @transform_0(%arg0: i32) -> (i32, i32) {
    %c0_i32 = arith.constant 0 : i32
    %c0_i32_0 = arith.constant 0 : i32
    %c0_i32_1 = arith.constant 0 : i32
    return %c0_i32, %c0_i32_0 : i32, i32
  }
  func.func @transform_1(%arg0: i32) -> (i32, i32) {
    %c0_i32 = arith.constant 0 : i32
    %c0_i32_0 = arith.constant 0 : i32
    %c0_i32_1 = arith.constant 0 : i32
    return %c0_i32, %c0_i32_0 : i32, i32
  }
  func.func @transform_2(%arg0: i32) -> (i32, i32) {
    %c0_i32 = arith.constant 0 : i32
    %c0_i32_0 = arith.constant 0 : i32
    %c0_i32_1 = arith.constant 0 : i32
    return %c0_i32, %c0_i32_0 : i32, i32
  }
  func.func @transform_3(%arg0: i32) -> (i32, i32) {
    %c0_i32 = arith.constant 0 : i32
    %c0_i32_0 = arith.constant 0 : i32
    %c0_i32_1 = arith.constant 0 : i32
    return %c0_i32, %c0_i32_0 : i32, i32
  }
  func.func @transform_4(%arg0: i32) -> (i32, i32) {
    %c0_i32 = arith.constant 0 : i32
    %c0_i32_0 = arith.constant 0 : i32
    %c0_i32_1 = arith.constant 0 : i32
    return %c0_i32, %c0_i32_0 : i32, i32
  }
  func.func @transform_5(%arg0: i32) -> (i32, i32) {
    %c0_i32 = arith.constant 0 : i32
    %c0_i32_0 = arith.constant 0 : i32
    %c0_i32_1 = arith.constant 0 : i32
    return %c0_i32, %c0_i32_0 : i32, i32
  }
  func.func @transform_6(%arg0: i32) -> (i32, i32) {
    %c0_i32 = arith.constant 0 : i32
    %c0_i32_0 = arith.constant 0 : i32
    %c0_i32_1 = arith.constant 0 : i32
    return %c0_i32, %c0_i32_0 : i32, i32
  }
  func.func @transform_7(%arg0: i32) -> (i32, i32) {
    %c0_i32 = arith.constant 0 : i32
    %c0_i32_0 = arith.constant 0 : i32
    %c0_i32_1 = arith.constant 0 : i32
    return %c0_i32, %c0_i32_0 : i32, i32
  }
  func.func @transform_8(%arg0: i32) -> (i32, i32) {
    %c0_i32 = arith.constant 0 : i32
    %c0_i32_0 = arith.constant 0 : i32
    %c0_i32_1 = arith.constant 0 : i32
    return %c0_i32, %c0_i32_0 : i32, i32
  }
  func.func @transform_9(%arg0: i32) -> (i32, i32) {
    %c0_i32 = arith.constant 0 : i32
    %c0_i32_0 = arith.constant 0 : i32
    %c0_i32_1 = arith.constant 0 : i32
    return %c0_i32, %c0_i32_0 : i32, i32
  }
  func.func @transform_10(%arg0: i32) -> (i32, i32) {
    %c0_i32 = arith.constant 0 : i32
    %c0_i32_0 = arith.constant 0 : i32
    %c0_i32_1 = arith.constant 0 : i32
    return %c0_i32, %c0_i32_0 : i32, i32
  }
  func.func @transform_11(%arg0: i32) -> (i32, i32) {
    %c0_i32 = arith.constant 0 : i32
    %c0_i32_0 = arith.constant 0 : i32
    %c0_i32_1 = arith.constant 0 : i32
    return %c0_i32, %c0_i32_0 : i32, i32
  }
  func.func @transform_12(%arg0: i32) -> (i32, i32) {
    %c0_i32 = arith.constant 0 : i32
    %c0_i32_0 = arith.constant 0 : i32
    %c0_i32_1 = arith.constant 0 : i32
    return %c0_i32, %c0_i32_0 : i32, i32
  }
}

</mosaic_0001>

<bundles_post_ra>
// kernel: tpu_custom_call.1
= control target key start
LH: loop header
LB: loop body
LE: loop exit
PB: predicated region body
PF: predicated region fallthrough
CT: control target
= control target key end

     0   :  { %s1908_s0 = inlined_call_operand.vmem [shape: f32[16,32], index: 0, kind: input, shape index: {}]   ;;  %s1909_s1 = inlined_call_operand.vmem [shape: f32[32,64], index: 1, kind: input, shape index: {}]   ;;  %s1910_s2 = inlined_call_operand.vmem [shape: f32[32,64], index: 2, kind: input, shape index: {}]   ;;  %s1911_s3 = inlined_call_operand.vmem [shape: f32[4,64], index: 3, kind: input, shape index: {}]   ;;  %s1912_s4 = inlined_call_operand.vmem [shape: f32[1,64], index: 4, kind: input, shape index: {}]   ;;  %s1913_s5 = inlined_call_operand.vmem [shape: f32[64,64], index: 5, kind: input, shape index: {}]   ;;  %s1914_s6 = inlined_call_operand.vmem [shape: f32[64,16], index: 6, kind: input, shape index: {}]   ;;  %s1915_s7 = inlined_call_operand.vmem [shape: f32[64,16], index: 7, kind: input, shape index: {}]   ;;  %s1916_s8 = inlined_call_operand.vmem [shape: f32[1,64], index: 8, kind: input, shape index: {}]   ;;  %s1917_s9 = inlined_call_operand.vmem [shape: f32[16,128], index: 9, kind: input, shape index: {}]   ;;  %s1918_s10 = inlined_call_operand.vmem [shape: f32[1,128], index: 10, kind: input, shape index: {}]   ;;  %s1919_s11 = inlined_call_operand.vmem [shape: f32[128,64], index: 11, kind: input, shape index: {}]   ;;  %s1920_s12 = inlined_call_operand.hbm [shape: f32[8,64], index: 12, kind: output, shape index: {}]  }
   0x1   :  { %v47_v0 = vld [vmem:[%s1909_s1 + $0x18] sm:$0xff]  ;;  %v46_v1 = vld [vmem:[%s1909_s1 + $0x10] sm:$0xff]  ;;  %v45_v2 = vld [vmem:[%s1909_s1 + $0x8] sm:$0xff] }
   0x2   :  { %67 = vmatpush.msra.mxu0 %v47_v0  ;;  %v81_v3 = vld [vmem:[%s1910_s2 + $0x18] sm:$0xff]  ;;  %v80_v4 = vld [vmem:[%s1910_s2 + $0x10] sm:$0xff]  ;;  %v44_v5 = vld [vmem:[%s1909_s1] sm:$0xff] }
   0x3   :  { %94 = vmatpush.msra.mxu2 %v81_v3  ;;  %v79_v6 = vld [vmem:[%s1910_s2 + $0x8] sm:$0xff] }
   0x4   :  { %68 = vmatpush.msra.mxu0 %v46_v1 }
   0x5   :  { %17 = vsyncpa [#allocation4], 0  ;;  %v42_v7 = vld [vmem:[%s1908_s0] sm:$0xff]  ;;  %vm48_vm0 = vcmask 261120   ;;  %95 = vmatpush.msra.mxu2 %v80_v4  ;;  %v43_v9 = vld [vmem:[%s1908_s0 + $0x8] sm:$0xff]  ;;  %v106_v10 = vlaneseq  ;;  %s1278_s17 = smov [#allocation3]  }
   0x6   :  { %69 = vmatpush.msra.mxu0 %v45_v2  ;;  %v78_v8 = vld [vmem:[%s1910_s2] sm:$0xff]  ;;  %v352_v12 = vld [vmem:[%s1915_s7 + $0x38] sm:$0xff]  ;;  %v351_v15 = vld [vmem:[%s1915_s7 + $0x30] sm:$0xff]  ;;  %s1141_s18 = sshll.u32 %s1278_s17, 4  ;;  %s1143_s1 = sshll.u32 %s1920_s12, 4  ;;  %s1142_s18 = int_to_ptr.vmem [resolvable:$true] %s1141_s18  ;;  %s1144_s1 = int_to_ptr.hbm [resolvable:$true] %s1143_s1 }
   0x7   :  { %96 = vmatpush.msra.mxu2 %v79_v6  ;;  %v1374_v11 = vshrl.u32 %v106_v10, 7  ;;  %v243_v13 = vld [vmem:[%s1913_s5 + $0x38] sm:$0xff]  ;;  %v242_v16 = vld [vmem:[%s1913_s5 + $0x30] sm:$0xff]  ;;  %v350_v18 = vld [vmem:[%s1915_s7 + $0x28] sm:$0xff] }
   0x8   :  { %70 = vmatpush.msra.mxu0 %v44_v5  ;;  %v321_v14 = vld [vmem:[%s1914_s6 + $0x38] sm:$0xff]  ;;  %v320_v17 = vld [vmem:[%s1914_s6 + $0x30] sm:$0xff]  ;;  %v241_v19 = vld [vmem:[%s1913_s5 + $0x28] sm:$0xff] }
   0x9   :  { %1152 = vmatmul.msk.f32.vlgmr.msra.gmra.mxu0 %vm48_vm0, %v42_v7  ;;  %97 = vmatpush.msra.mxu2 %v78_v8  ;;  %v319_v20 = vld [vmem:[%s1914_s6 + $0x28] sm:$0xff]  ;;  %v349_v21 = vld [vmem:[%s1915_s7 + $0x20] sm:$0xff]  ;;  %v348_v24 = vld [vmem:[%s1915_s7 + $0x18] sm:$0xff]  ;;  %v1452_v36 = vadd.s32 8, %v1374_v11  ;;  %v113_v39 = vand.u32 7, %v1374_v11  ;;  %vm138_vm1 = vcmp.lt.s32.totalorder %v1374_v11, 3 }
   0xa   :  { %1154 = vmatmul.msk.f32.vlgmr.msra.gmra.mxu2 %vm48_vm0, %v42_v7  ;;  %1170 = vset.pattern.permute.xlu0 %v1374_v11  ;;  %v240_v22 = vld [vmem:[%s1913_s5 + $0x20] sm:$0xff]  ;;  %v239_v25 = vld [vmem:[%s1913_s5 + $0x18] sm:$0xff]  ;;  %v347_v27 = vld [vmem:[%s1915_s7 + $0x10] sm:$0xff]  ;;  %vm156_vm2 = vcmp.lt.s32.totalorder %v1374_v11, 2  ;;  %vm174_vm5 = vcmp.lt.s32.totalorder %v1374_v11, 1 }
   0xb   :  { %1168 = vset.pattern.permute.xlu1 %v1374_v11  ;;  %1167 = vset.pattern.permute.xlu2 %v1374_v11  ;;  %v318_v23 = vld [vmem:[%s1914_s6 + $0x20] sm:$0xff]  ;;  %v317_v26 = vld [vmem:[%s1914_s6 + $0x18] sm:$0xff]  ;;  %v238_v28 = vld [vmem:[%s1913_s5 + $0x10] sm:$0xff]  ;;  %v120_v40 = vand.u32 7, %v1452_v36  ;;  %vm141_vm3 = vcmp.ge.s32.totalorder %v113_v39, 3  ;;  %vm159_vm6 = vcmp.ge.s32.totalorder %v113_v39, 2 }
   0xc   :  { %361 = vmatpush.msrb.mxu0 %v352_v12  ;;  %263 = vmatpush.msrb.mxu2 %v243_v13  ;;  %v316_v29 = vld [vmem:[%s1914_s6 + $0x10] sm:$0xff]  ;;  %v346_v30 = vld [vmem:[%s1915_s7 + $0x8] sm:$0xff]  ;;  %v345_v33 = vld [vmem:[%s1915_s7] sm:$0xff]  ;;  %vm177_vm8 = vcmp.ge.s32.totalorder %v113_v39, 1 }
   0xd   :  { %330 = vmatpush.msra.mxu3 %v321_v14  ;;  %v237_v31 = vld [vmem:[%s1913_s5 + $0x8] sm:$0xff]  ;;  %v236_v34 = vld [vmem:[%s1913_s5] sm:$0xff]  ;;  %vm142_vm4 = vcmp.ge.s32.totalorder %v120_v40, 3  ;;  %vm160_vm7 = vcmp.ge.s32.totalorder %v120_v40, 2  ;;  %vm178_vm9 = vcmp.ge.s32.totalorder %v120_v40, 1 }
   0xe   :  { %362 = vmatpush.msrb.mxu0 %v351_v15  ;;  %264 = vmatpush.msrb.mxu2 %v242_v16  ;;  %v315_v32 = vld [vmem:[%s1914_s6 + $0x8] sm:$0xff]  ;;  %v314_v35 = vld [vmem:[%s1914_s6] sm:$0xff] }
   0xf   :  { %331 = vmatpush.msra.mxu3 %v320_v17  ;;  %v105_v38 = vld [vmem:[%s1911_s3] sm:$0xf]  ;;  %s1277_s3 = smov 64  }
  0x10   :  { %363 = vmatpush.msrb.mxu0 %v350_v18  ;;  %265 = vmatpush.msrb.mxu2 %v241_v19  ;;  %v133_v41 = vperm.slane %v105_v38, 3  ;;  %v149_v42 = vperm.slane %v105_v38, 0  ;;  %v167_v44 = vperm.slane %v105_v38, 1  ;;  %v185_v52 = vperm.slane %v105_v38, 2  ;;  %v1192_v15 = vld [vmem:[%s1912_s4] ss:$0 sm:$0xff] }
  0x11   :  { %1153 = vmatmul.msk.f32.gmra.mxu0 %vm48_vm0, %v43_v9  ;;  %332 = vmatpush.msra.mxu3 %v319_v20 }
  0x12   :  { %1155 = vmatmul.msk.f32.gmra.mxu2 %vm48_vm0, %v43_v9  ;;  %364 = vmatpush.msrb.mxu0 %v349_v21 }
  0x13   :  { %266 = vmatpush.msrb.mxu2 %v240_v22  ;;  %333 = vmatpush.msra.mxu3 %v318_v23 }
  0x14   :  { %365 = vmatpush.msrb.mxu0 %v348_v24 }
  0x15   :  { %267 = vmatpush.msrb.mxu2 %v239_v25  ;;  %334 = vmatpush.msra.mxu3 %v317_v26 }
  0x16   :  { %366 = vmatpush.msrb.mxu0 %v347_v27 }
  0x17   :  { %268 = vmatpush.msrb.mxu2 %v238_v28  ;;  %335 = vmatpush.msra.mxu3 %v316_v29 }
  0x18   :  { %367 = vmatpush.msrb.mxu0 %v346_v30 }
  0x19   :  { %269 = vmatpush.msrb.mxu2 %v237_v31  ;;  %336 = vmatpush.msra.mxu3 %v315_v32 }
  0x1a   :  { %368 = vmatpush.msrb.mxu0 %v345_v33 }
  0x1b   :  { %270 = vmatpush.msrb.mxu2 %v236_v34  ;;  %337 = vmatpush.msra.mxu3 %v314_v35 }
  0x86   :  { %v72_v37 = vpop.f32.mrf.mxu0 }
  0x87   :  { %v136_v46 = vrot.slane %v72_v37, 5  ;;  %v154_v47 = vrot.slane %v72_v37, 6  ;;  %v172_v50 = vrot.slane %v72_v37, 7  ;;  %v134_v61 = vmul.f32 %v133_v41, %v72_v37 }
  0x8d   :  { %v1462_v45 = vpop.f32.mrf.mxu2 }
  0x8e   :  { %v75_v43 = vpop.f32.mrf.mxu0 }
  0x8f   :  { %v137_v48 = vrot.slane %v75_v43, 5  ;;  %v155_v49 = vrot.slane %v75_v43, 6  ;;  %v173_v51 = vrot.slane %v75_v43, 7  ;;  %v135_v62 = vmul.f32 %v133_v41, %v75_v43 }
  0x91   :  { %v139_v53 = vsel %vm138_vm1, %v136_v46, %v137_v48  ;;  %v140_v54 = vsel %vm138_vm1, %v137_v48, %v136_v46  ;;  %v157_v55 = vsel %vm156_vm2, %v154_v47, %v155_v49  ;;  %v158_v56 = vsel %vm156_vm2, %v155_v49, %v154_v47 }
  0x92   :  { %v147_v57 = vsel %vm141_vm3, %v140_v54, 0.0  ;;  %v148_v58 = vsel %vm142_vm4, %v139_v53, 0.0  ;;  %v165_v59 = vsel %vm159_vm6, %v158_v56, 0.0  ;;  %v166_v60 = vsel %vm160_vm7, %v157_v55, 0.0  ;;  %v1501_v54 = vld [vmem:[%s1916_s8] ss:$0 sm:$0xff] }
  0x93   :  { %v150_v63 = vmul.f32 %v149_v42, %v147_v57  ;;  %v151_v0 = vmul.f32 %v149_v42, %v148_v58  ;;  %v168_v1 = vmul.f32 %v167_v44, %v165_v59  ;;  %v169_v2 = vmul.f32 %v167_v44, %v166_v60 }
  0x94   :  { %v175_v3 = vsel %vm174_vm5, %v172_v50, %v173_v51  ;;  %v176_v4 = vsel %vm174_vm5, %v173_v51, %v172_v50  ;;  %vm248_vm1 = vcmask 523264  }
  0x95   :  { %v152_v5 = vadd.f32 %v150_v63, %v134_v61  ;;  %v153_v6 = vadd.f32 %v151_v0, %v135_v62  ;;  %v183_v7 = vsel %vm177_vm8, %v176_v4, 0.0  ;;  %v184_v8 = vsel %vm178_vm9, %v175_v3, 0.0  ;;  %v102_v9 = vpop.f32.mrf.mxu2 }
  0x96   :  { %v186_v12 = vmul.f32 %v185_v52, %v183_v7  ;;  %v187_v13 = vmul.f32 %v185_v52, %v184_v8  ;;  %381 = vrot.lane.b32.xlu0 %v102_v9, %s1277_s3 }
  0x97   :  { %v171_v10 = vadd.f32 %v169_v2, %v153_v6  ;;  %v170_v14 = vadd.f32 %v168_v1, %v152_v5 }
  0x99   :  { %v188_v16 = vadd.f32 %v186_v12, %v170_v14  ;;  %v189_v17 = vadd.f32 %v187_v13, %v171_v10 }
  0x9b   :  { %v194_v18 = vadd.f32 %v1192_v15, %v188_v16  ;;  %v195_v19 = vadd.f32 %v1192_v15, %v189_v17 }
  0x9d   :  { %v1156_v20 = vmul.f32 -1.442695, %v194_v18  ;;  %v1157_v21 = vmul.f32 -1.442695, %v195_v19 }
  0x9f   :  { %1195 = vpow2.f32 %v1156_v20 }
  0xa0   :  { %1197 = vpow2.f32 %v1157_v21 }
  0xa5   :  { %v1196_v22 = vpop.eup %1195 }
  0xa6   :  { %v1198_v23 = vpop.eup %1197  ;;  %v202_v24 = vadd.f32 1.0, %v1196_v22 }
  0xa7   :  { %v203_v25 = vadd.f32 1.0, %v1198_v23 }
  0xa8   :  { %1199 = vrcp.f32 %v202_v24  ;;  %v215_v31 = vand.u32 2147483648, %v202_v24  ;;  %v213_v34 = vand.u32 2147483647, %v202_v24  ;;  %vm209_vm12 = vweird.f32 %v202_v24 }
  0xa9   :  { %1201 = vrcp.f32 %v203_v25  ;;  %v230_v35 = vand.u32 2147483648, %v203_v25  ;;  %v228_v38 = vand.u32 2147483647, %v203_v25  ;;  %vm224_vm14 = vweird.f32 %v203_v25 }
  0xaa   :  { %v216_v40 = vor.u32 1.1754944e-38, %v215_v31  ;;  %vm214_vm15 = vcmp.eq.f32.partialorder %v213_v34, 8.507059e+37 }
  0xab   :  { %v231_v43 = vor.u32 1.1754944e-38, %v230_v35  ;;  %vm229_vm2 = vcmp.eq.f32.partialorder %v228_v38, 8.507059e+37 }
  0xae   :  { %v1200_v26 = vpop.eup %1199 }
  0xaf   :  { %v1202_v27 = vpop.eup %1201  ;;  %v205_v28 = vmul.f32 %v1200_v26, %v202_v24  ;;  %vm210_vm10 = vweird.f32 %v1200_v26 }
  0xb0   :  { %v220_v29 = vmul.f32 %v1202_v27, %v203_v25  ;;  %vm225_vm11 = vweird.f32 %v1202_v27  ;;  %vm211_vm13 = vmor %vm209_vm12, %vm210_vm10 }
  0xb1   :  { %v206_v30 = vsub.f32 1.0, %v205_v28  ;;  %vm226_vm0 = vmor %vm224_vm14, %vm225_vm11 }
  0xb2   :  { %v221_v32 = vsub.f32 1.0, %v220_v29 }
  0xb3   :  { %v207_v33 = vmul.f32 %v1200_v26, %v206_v30 }
  0xb4   :  { %v222_v37 = vmul.f32 %v1202_v27, %v221_v32 }
  0xb5   :  { %v208_v39 = vadd.f32 %v1200_v26, %v207_v33 }
  0xb6   :  { %v223_v41 = vadd.f32 %v1202_v27, %v222_v37 }
  0xb7   :  { %v212_v42 = vsel %vm211_vm13, %v1200_v26, %v208_v39 }
  0xb8   :  { %v217_v44 = vsel %vm214_vm15, %v216_v40, %v212_v42  ;;  %v227_v46 = vsel %vm226_vm0, %v1202_v27, %v223_v41 }
  0xb9   :  { %v1486_v47 = vmul.f32 %v217_v44, %v194_v18  ;;  %v232_v48 = vsel %vm229_vm2, %v231_v43, %v227_v46 }
  0xba   :  { %v235_v49 = vmul.f32 %v232_v48, %v195_v19 }
  0xbb   :  { %1158 = vmatmul.msk.f32.vlgmr.msrb.gmra.mxu2 %vm248_vm1, %v1486_v47  ;;  %1160 = vmatmul.msk.f32.vlgmr.msra.gmra.mxu3 %vm248_vm1, %v1486_v47 }
  0xbc   :  { %1162 = vmatmul.msk.f32.vlgmr.msrb.gmra.mxu0 %vm248_vm1, %v1486_v47  ;;  %376 = vrot.lane.b32.xlu0 %v235_v49, %s1277_s3 }
  0xc3   :  { %1159 = vmatmul.msk.f32.gmra.mxu2 %vm248_vm1, %v235_v49  ;;  %1161 = vmatmul.msk.f32.gmra.mxu3 %vm248_vm1, %v235_v49 }
  0xc4   :  { %1163 = vmatmul.msk.f32.gmra.mxu0 %vm248_vm1, %v235_v49 }
 0x108   :  { %v1542_v14 = vpop.permute.xlu0 %381 }
 0x12e   :  { %v1551_v17 = vpop.permute.xlu0 %376 }
 0x139   :  { %v370_v50 = vpop.f32.mrf.mxu0 }
 0x13a   :  { %v627_v51 = vperm.slane %v370_v50, 1  ;;  %v614_v52 = vperm.slane %v370_v50, 0  ;;  %v653_v53 = vperm.slane %v370_v50, 3  ;;  %v640_v58 = vperm.slane %v370_v50, 2 }
 0x13b   :  { %v666_v0 = vperm.slane %v370_v50, 4  ;;  %v692_v3 = vperm.slane %v370_v50, 6  ;;  %v679_v4 = vperm.slane %v370_v50, 5  ;;  %v705_v5 = vperm.slane %v370_v50, 7 }
 0x13c   :  { %632 = vperm.xlu1 %1168, %v627_v51   ;;  %619 = vperm.xlu2 %1167, %v614_v52  }
 0x13d   :  { %658 = vperm.xlu0 %1170, %v653_v53  }
 0x13e   :  { %v272_v55 = vpop.f32.mrf.mxu2  ;;  %v1506_v57 = vpop.f32.mrf.mxu3 }
 0x13f   :  { %v1504_v56 = vadd.f32 %v1501_v54, %v272_v55  ;;  %v442_v59 = vperm.slane %v1506_v57, 4  ;;  %v403_v6 = vperm.slane %v1506_v57, 1  ;;  %v390_v7 = vperm.slane %v1506_v57, 0 }
 0x140   :  { %v468_v8 = vperm.slane %v1506_v57, 6  ;;  %v416_v9 = vperm.slane %v1506_v57, 2  ;;  %v429_v12 = vperm.slane %v1506_v57, 3  ;;  %v455_v15 = vperm.slane %v1506_v57, 5 }
 0x141   :  { %v1510_v60 = vpop.f32.mrf.mxu0  ;;  %v481_v19 = vperm.slane %v1506_v57, 7  ;;  %vm280_vm6 = vcmp.ne.f32.partialorder %v1504_v56, %v1504_v56 }
 0x142   :  { %v718_v61 = vperm.slane %v1510_v60, 0  ;;  %v783_v2 = vperm.slane %v1510_v60, 5  ;;  %v744_v13 = vperm.slane %v1510_v60, 2  ;;  %v809_v16 = vperm.slane %v1510_v60, 7 }
 0x144   :  { %645 = vperm.xlu1 %1168, %v640_v58   ;;  %1169 = vset.pattern.permute.xlu2 %v1452_v36 }
 0x145   :  { %447 = vperm.xlu0 %1170, %v442_v59  }
 0x146   :  { %v1516_v62 = vpop.f32.mrf.mxu3  ;;  %v275_v34 = vpop.f32.mrf.mxu2 }
 0x147   :  { %v507_v63 = vperm.slane %v1516_v62, 1  ;;  %v572_v1 = vperm.slane %v1516_v62, 6  ;;  %v533_v10 = vperm.slane %v1516_v62, 3  ;;  %v494_v22 = vperm.slane %v1516_v62, 0 }
 0x148   :  { %v520_v33 = vperm.slane %v1516_v62, 2  ;;  %v276_v39 = vadd.f32 %v1501_v54, %v275_v34  ;;  %v546_v43 = vperm.slane %v1516_v62, 4  ;;  %v559_v48 = vperm.slane %v1516_v62, 5 }
 0x149   :  { %v770_v34 = vperm.slane %v1510_v60, 4 }
 0x14a   :  { %v285_v41 = vand.u32 2147483647, %v276_v39  ;;  %vm281_vm4 = vcmp.ne.f32.partialorder %v276_v39, %v276_v39 }
 0x14c   :  { %1171 = vset.pattern.permute.xlu1 %v1452_v36  ;;  %638 = vperm.xlu2 %1169, %v627_v51   ;;  %v287_v42 = vsub.f32 0.0, %v285_v41 }
 0x14d   :  { %723 = vperm.xlu0 %1170, %v718_v61  }
 0x14e   :  { %v290_v46 = vmul.f32 1.442695, %v287_v42 }
 0x150   :  { %1203 = vpow2.f32 %v290_v46 }
 0x154   :  { %664 = vperm.xlu1 %1171, %v653_v53   ;;  %651 = vperm.xlu2 %1169, %v640_v58  }
 0x155   :  { %512 = vperm.xlu0 %1170, %v507_v63  }
 0x156   :  { %v1204_v50 = vpop.eup %1203 }
 0x157   :  { %v301_v51 = vadd.f32 1.0, %v1204_v50  ;;  %v304_v53 = vmul.f32 -0.5, %v1204_v50  ;;  %v307_v57 = vand.u32 2147483647, %v1204_v50 }
 0x159   :  { %1205 = vlog2.f32 %v301_v51  ;;  %v305_v55 = vadd.f32 1.0, %v304_v53  ;;  %vm308_vm3 = vcmp.lt.f32.partialorder %v307_v57, 0.0004427343 }
 0x15c   :  { %677 = vperm.xlu1 %1171, %v666_v0   ;;  %1172 = vset.pattern.permute.xlu2 %v1374_v11 }
 0x15d   :  { %577 = vperm.xlu0 %1170, %v572_v1  }
 0x15f   :  { %v1206_v54 = vpop.eup %1205 }
 0x164   :  { %1173 = vset.pattern.permute.xlu1 %v1374_v11  ;;  %671 = vperm.xlu2 %1172, %v666_v0   ;;  %v585_v0 = vperm.slane %v1516_v62, 7 }
 0x165   :  { %788 = vperm.xlu0 %1170, %v783_v2  }
 0x16c   :  { %697 = vperm.xlu1 %1173, %v692_v3   ;;  %684 = vperm.xlu2 %1172, %v679_v4  }
 0x16d   :  { %1189 = vset.pattern.permute.xlu0 %v1452_v36 }
 0x174   :  { %710 = vperm.xlu1 %1173, %v705_v5   ;;  %1174 = vset.pattern.permute.xlu2 %v1452_v36 }
 0x175   :  { %414 = vperm.xlu0 %1189, %v403_v6  }
 0x17c   :  { %703 = vperm.xlu2 %1174, %v692_v3   ;;  %395 = vperm.xlu1 %1173, %v390_v7   ;;  %v306_v3 = vmul.f32 %v1204_v50, %v305_v55 }
 0x17d   :  { %479 = vperm.xlu0 %1189, %v468_v8  }
 0x184   :  { %716 = vperm.xlu2 %1174, %v705_v5   ;;  %421 = vperm.xlu1 %1173, %v416_v9   ;;  %v279_v5 = vmax.f32 %v276_v39, 0.0 }
 0x185   :  { %544 = vperm.xlu0 %1189, %v533_v10  }
 0x18c   :  { %401 = vperm.xlu2 %1174, %v390_v7   ;;  %434 = vperm.xlu1 %1173, %v429_v12  }
 0x18d   :  { %625 = vperm.xlu0 %1189, %v614_v52  }
 0x194   :  { %1175 = vset.pattern.permute.xlu2 %v1374_v11  ;;  %1177 = vset.pattern.permute.xlu1 %v1452_v36 }
 0x195   :  { %690 = vperm.xlu0 %1189, %v679_v4  }
 0x196   :  { %v620_v20 = vpop.permute.xlu2 %619 }
 0x19c   :  { %408 = vperm.xlu2 %1175, %v403_v6   ;;  %453 = vperm.xlu1 %1177, %v442_v59   ;;  %v303_v59 = vmul.f32 0.6931472, %v1206_v54 }
 0x19d   :  { %755 = vperm.xlu0 %1189, %v744_v13  }
 0x19e   :  { %v309_v4 = vsel %vm308_vm3, %v306_v3, %v303_v59 }
 0x19f   :  { %v311_v6 = vadd.f32 %v309_v4, %v279_v5 }
 0x1a4   :  { %1176 = vset.pattern.permute.xlu2 %v1452_v36  ;;  %466 = vperm.xlu1 %1177, %v455_v15  }
 0x1a5   :  { %820 = vperm.xlu0 %1189, %v809_v16  }
 0x1a6   :  { %v1560_v23 = vpop.permute.xlu2 %638 }
 0x1ac   :  { %427 = vperm.xlu2 %1176, %v416_v9   ;;  %1179 = vset.pattern.permute.xlu1 %v1374_v11 }
 0x1ae   :  { %v1563_v25 = vpop.permute.xlu1 %632  ;;  %v1569_v27 = vpop.permute.xlu2 %651 }
 0x1af   :  { %v1554_v18 = vpop.permute.xlu0 %658 }
 0x1b4   :  { %440 = vperm.xlu2 %1176, %v429_v12   ;;  %486 = vperm.xlu1 %1179, %v481_v19  }
 0x1b6   :  { %v1573_v29 = vpop.permute.xlu1 %645 }
 0x1b7   :  { %v1557_v21 = vpop.permute.xlu0 %447 }
 0x1bc   :  { %1178 = vset.pattern.permute.xlu2 %v1374_v11  ;;  %499 = vperm.xlu1 %1179, %v494_v22  }
 0x1be   :  { %v1577_v30 = vpop.permute.xlu2 %671 }
 0x1bf   :  { %v724_v24 = vpop.permute.xlu0 %723 }
 0x1c0   :  { %v1566_v26 = vsel %vm248_vm1, %v620_v20, %v724_v24 }
 0x1c4   :  { %460 = vperm.xlu2 %1178, %v455_v15   ;;  %1181 = vset.pattern.permute.xlu1 %v1452_v36 }
 0x1c6   :  { %v1581_v32 = vpop.permute.xlu1 %664  ;;  %v685_v35 = vpop.permute.xlu2 %684 }
 0x1c7   :  { %v1571_v28 = vpop.permute.xlu0 %512 }
 0x1cc   :  { %473 = vperm.xlu2 %1178, %v468_v8   ;;  %518 = vperm.xlu1 %1181, %v507_v63  }
 0x1ce   :  { %v1589_v40 = vpop.permute.xlu1 %677 }
 0x1cf   :  { %v1579_v31 = vpop.permute.xlu0 %577 }
 0x1d4   :  { %1180 = vset.pattern.permute.xlu2 %v1452_v36  ;;  %531 = vperm.xlu1 %1181, %v520_v33  }
 0x1d6   :  { %v1604_v58 = vpop.permute.xlu2 %703 }
 0x1d7   :  { %v789_v37 = vpop.permute.xlu0 %788  ;;  %1922 = vst [vmem:[#allocation7_spill] sm:$0xff] %v1604_v58 }
 0x1d8   :  { %v1586_v38 = vsel %vm248_vm1, %v685_v35, %v789_v37 }
 0x1dc   :  { %492 = vperm.xlu2 %1180, %v481_v19   ;;  %1183 = vset.pattern.permute.xlu1 %v1374_v11 }
 0x1de   :  { %v1593_v44 = vpop.permute.xlu1 %697  ;;  %v1610_v7 = vpop.permute.xlu2 %716 }
 0x1e4   :  { %505 = vperm.xlu2 %1180, %v494_v22   ;;  %551 = vperm.xlu1 %1183, %v546_v43   ;;  %v757_v22 = vperm.slane %v1510_v60, 3 }
 0x1e6   :  { %v1597_v49 = vpop.permute.xlu1 %710  ;;  %v1615_v9 = vpop.permute.xlu2 %401 }
 0x1e7   :  { %1921 = vst [vmem:[#allocation6_spill] sm:$0xff] %v1597_v49  ;;  %v415_v41 = vpop.permute.xlu0 %414 }
 0x1ec   :  { %1182 = vset.pattern.permute.xlu2 %v1374_v11  ;;  %564 = vperm.xlu1 %1183, %v559_v48  }
 0x1ee   :  { %v396_v52 = vpop.permute.xlu1 %395 }
 0x1f4   :  { %525 = vperm.xlu2 %1182, %v520_v33   ;;  %1185 = vset.pattern.permute.xlu1 %v1452_v36 }
 0x1f6   :  { %v1606_v63 = vpop.permute.xlu1 %421  ;;  %v1622_v12 = vpop.permute.xlu2 %408 }
 0x1fc   :  { %538 = vperm.xlu2 %1182, %v533_v10   ;;  %583 = vperm.xlu1 %1185, %v572_v1   ;;  %v313_v1 = vsel %vm281_vm4, %v276_v39, %v311_v6  ;;  %v731_v10 = vperm.slane %v1510_v60, 1  ;;  %v838_v6 = vld [vmem:[%s1917_s9] sm:$0xff] }
 0x1fe   :  { %v1612_v8 = vpop.permute.xlu1 %434 }
 0x204   :  { %1184 = vset.pattern.permute.xlu2 %v1452_v36  ;;  %596 = vperm.xlu1 %1185, %v585_v0  }
 0x206   :  { %v1627_v19 = vpop.permute.xlu2 %427 }
 0x20c   :  { %557 = vperm.xlu2 %1184, %v546_v43   ;;  %386 = vrot.lane.b32.xlu1 %v313_v1, %s1277_s3  ;;  %v796_v43 = vperm.slane %v1510_v60, 6 }
 0x20e   :  { %v1617_v62 = vpop.permute.xlu1 %453 }
 0x214   :  { %570 = vperm.xlu2 %1184, %v559_v48   ;;  %729 = vperm.xlu1 %1185, %v718_v61   ;;  %v1633_v61 = vpop.permute.xlu2 %440  ;;  %v1647_v48 = vpop.permute.xlu0 %479 }
 0x216   :  { %v1625_v15 = vpop.permute.xlu1 %466 }
 0x21c   :  { %1186 = vset.pattern.permute.xlu2 %v1374_v11  ;;  %742 = vperm.xlu1 %1185, %v731_v10  }
 0x21e   :  { %v461_v35 = vpop.permute.xlu2 %460 }
 0x224   :  { %590 = vperm.xlu2 %1186, %v585_v0   ;;  %1187 = vset.pattern.permute.xlu1 %v1374_v11 }
 0x226   :  { %v1630_v20 = vpop.permute.xlu1 %486  ;;  %v474_v37 = vpop.permute.xlu2 %473 }
 0x22c   :  { %736 = vperm.xlu2 %1186, %v731_v10   ;;  %762 = vperm.xlu1 %1187, %v757_v22  }
 0x22e   :  { %v500_v24 = vpop.permute.xlu1 %499 }
 0x22f   :  { %v1636_v33 = vsel %vm248_vm1, %v396_v52, %v500_v24 }
 0x234   :  { %749 = vperm.xlu2 %1186, %v744_v13   ;;  %775 = vperm.xlu1 %1187, %v770_v34   ;;  %v284_v13 = vand.u32 2147483647, %v1504_v56 }
 0x236   :  { %v493_v42 = vpop.permute.xlu2 %492  ;;  %v286_v50 = vsub.f32 0.0, %v284_v13 }
 0x23c   :  { %1188 = vset.pattern.permute.xlu2 %v1452_v36  ;;  %1190 = vset.pattern.permute.xlu1 %v1452_v36  ;;  %v288_v36 = vmul.f32 1.442695, %v286_v50  ;;  %v278_v50 = vmax.f32 %v1504_v56, 0.0 }
 0x23e   :  { %v519_v39 = vpop.permute.xlu1 %518  ;;  %v506_v51 = vpop.permute.xlu2 %505  ;;  %1207 = vpow2.f32 %v288_v36 }
 0x244   :  { %768 = vperm.xlu2 %1188, %v757_v22   ;;  %794 = vperm.xlu1 %1190, %v783_v2   ;;  %v545_v2 = vpop.permute.xlu0 %544  ;;  %v1208_v57 = vpop.eup %1207  ;;  %v839_v22 = vld [vmem:[%s1917_s9 + $0x8] sm:$0xff] }
 0x245   :  { %v292_v59 = vadd.f32 1.0, %v1208_v57  ;;  %v298_v60 = vand.u32 2147483647, %v1208_v57 }
 0x246   :  { %v532_v46 = vpop.permute.xlu1 %531 }
 0x247   :  { %1209 = vlog2.f32 %v292_v59  ;;  %vm299_vm5 = vcmp.lt.f32.partialorder %v298_v60, 0.0004427343  ;;  %v1690_v60 = vsel %vm248_vm1, %v474_v37, %v1579_v31 }
 0x24c   :  { %781 = vperm.xlu2 %1188, %v770_v34   ;;  %807 = vperm.xlu1 %1190, %v796_v43   ;;  %v1655_v3 = vpop.permute.xlu0 %625  ;;  %v840_v34 = vmul.f32 1.442695, %v838_v6 }
 0x24d   :  { %v1210_v5 = vpop.eup %1209 }
 0x24e   :  { %v526_v53 = vpop.permute.xlu2 %525  ;;  %1211 = vpow2.f32 %v840_v34 }
 0x254   :  { %1191 = vset.pattern.permute.xlu2 %v1374_v11  ;;  %v295_v11 = vmul.f32 -0.5, %v1208_v57  ;;  %v1663_v24 = vpop.permute.xlu0 %690  ;;  %v1212_v49 = vpop.eup %1211 }
 0x256   :  { %v552_v52 = vpop.permute.xlu1 %551  ;;  %v539_v0 = vpop.permute.xlu2 %538  ;;  %v296_v10 = vadd.f32 1.0, %v295_v11 }
 0x25c   :  { %801 = vperm.xlu2 %1191, %v796_v43   ;;  %v297_v43 = vmul.f32 %v1208_v57, %v296_v10  ;;  %v756_v58 = vpop.permute.xlu0 %755  ;;  %v1674_v57 = vsel %vm248_vm1, %v1486_v47, %v1551_v17  ;;  %v600_v10 = vsel %vm248_vm1, %v1622_v12, %v1571_v28  ;;  %v599_v47 = vsel %vm248_vm1, %v1615_v9, %v506_v51 }
 0x25d   :  { %v603_v17 = vsel %vm248_vm1, %v1627_v19, %v532_v46  ;;  %v602_v28 = vsel %vm248_vm1, %v1606_v63, %v526_v53  ;;  %v1701_v12 = vsel %vm248_vm1, %v1612_v8, %v539_v0  ;;  %v1709_v9 = vsub.f32 0.0, %v1212_v49 }
 0x25e   :  { %v565_v54 = vpop.permute.xlu1 %564 }
 0x25f   :  { %v1651_v55 = vsel %vm248_vm1, %v461_v35, %v565_v54  ;;  %v842_v35 = vmul.f32 1.442695, %v839_v22  ;;  %v1686_v22 = vsel %vm248_vm1, %v1569_v27, %v756_v58  ;;  %v1705_v27 = vsel %vm248_vm1, %v1557_v21, %v552_v52 }
 0x261   :  { %1213 = vpow2.f32 %v842_v35 }
 0x264   :  { %814 = vperm.xlu2 %1191, %v809_v16   ;;  %v294_v16 = vmul.f32 0.6931472, %v1210_v5 }
 0x266   :  { %v558_v4 = vpop.permute.xlu2 %557  ;;  %v300_v13 = vsel %vm299_vm5, %v297_v43, %v294_v16 }
 0x267   :  { %v310_v11 = vadd.f32 %v300_v13, %v278_v50  ;;  %v1214_v5 = vpop.eup %1213  ;;  %v1715_v19 = vsel %vm248_vm1, %v1617_v62, %v558_v4 }
 0x269   :  { %v312_v6 = vsel %vm280_vm6, %v1504_v56, %v310_v11  ;;  %v601_v56 = vsel %vm248_vm1, %v415_v41, %v519_v39 }
 0x26e   :  { %v584_v1 = vpop.permute.xlu1 %583  ;;  %v571_v36 = vpop.permute.xlu2 %570 }
 0x26f   :  { %v1719_v63 = vsel %vm248_vm1, %v1625_v15, %v571_v36  ;;  %v1723_v8 = vsel %vm248_vm1, %v1647_v48, %v584_v1 }
 0x276   :  { %v597_v54 = vpop.permute.xlu1 %596 }
 0x277   :  { %v1667_v59 = vsel %vm248_vm1, %v493_v42, %v597_v54  ;;  %v1682_v42 = vsel %vm248_vm1, %v1633_v61, %v545_v2  ;;  %v1711_v61 = vsub.f32 0.0, %v1214_v5 }
 0x27e   :  { %v1707_v31 = vpop.permute.xlu2 %590  ;;  %v387_v58 = vpop.permute.xlu1 %386 }
 0x27f   :  { %v1726_v21 = vsel %vm248_vm1, %v312_v6, %v387_v58 }
 0x280   :  { %v1730_v49 = vmul.f32 %v1726_v21, %v1674_v57  ;;  %v847_v37 = vrot.slane %v1726_v21, 1  ;;  %v854_v62 = vperm.slane %v1726_v21, 0  ;;  %v848_v39 = vrot.slane %v1726_v21, 2 }
 0x281   :  { %v849_v15 = vrot.slane %v1726_v21, 3  ;;  %v850_v41 = vrot.slane %v1726_v21, 4  ;;  %v851_v46 = vrot.slane %v1726_v21, 5  ;;  %v852_v48 = vrot.slane %v1726_v21, 6 }
 0x282   :  { %v855_v51 = vperm.slane %v847_v37, 0  ;;  %v870_v52 = vmul.f32 %v854_v62, %v1709_v9  ;;  %v920_v53 = vrot.slane %v1730_v49, 1  ;;  %v927_v2 = vperm.slane %v1730_v49, 0 }
 0x283   :  { %v871_v0 = vmul.f32 %v854_v62, %v1711_v61  ;;  %v856_v4 = vperm.slane %v848_v39, 0  ;;  %v921_v1 = vrot.slane %v1730_v49, 2  ;;  %v857_v16 = vperm.slane %v849_v15, 0 }
 0x284   :  { %v872_v34 = vmul.f32 %v855_v51, %v1709_v9  ;;  %v886_v35 = vmul.f32 1.442695, %v870_v52  ;;  %v928_v43 = vperm.slane %v920_v53, 0  ;;  %v943_v13 = vmul.f32 %v927_v2, %v1636_v33 }
 0x285   :  { %v873_v50 = vmul.f32 %v855_v51, %v1711_v61  ;;  %v888_v36 = vmul.f32 1.442695, %v871_v0  ;;  %v944_v54 = vmul.f32 %v927_v2, %v599_v47  ;;  %v874_v11 = vmul.f32 %v856_v4, %v1709_v9 }
 0x286   :  { %v737_v5 = vpop.permute.xlu2 %736  ;;  %1215 = vpow2.f32 %v886_v35  ;;  %v890_v6 = vmul.f32 1.442695, %v872_v34  ;;  %v945_v58 = vmul.f32 %v928_v43, %v600_v10  ;;  %v730_v37 = vpop.permute.xlu1 %729  ;;  %v875_v62 = vmul.f32 %v856_v4, %v1711_v61 }
 0x287   :  { %v1751_v39 = vsel %vm248_vm1, %v1563_v25, %v737_v5  ;;  %1217 = vpow2.f32 %v888_v36  ;;  %v892_v15 = vmul.f32 1.442695, %v873_v50  ;;  %v823_v33 = vsel %vm248_vm1, %v1655_v3, %v730_v37 }
 0x288   :  { %1219 = vpow2.f32 %v890_v6  ;;  %v894_v47 = vmul.f32 1.442695, %v874_v11  ;;  %v896_v51 = vmul.f32 1.442695, %v875_v62  ;;  %v929_v52 = vperm.slane %v921_v1, 0 }
 0x289   :  { %1221 = vpow2.f32 %v892_v15  ;;  %v946_v53 = vmul.f32 %v928_v43, %v601_v56  ;;  %v877_v10 = vmul.f32 %v857_v16, %v1711_v61  ;;  %v922_v2 = vrot.slane %v1730_v49, 3 }
 0x28a   :  { %1223 = vpow2.f32 %v894_v47  ;;  %v947_v0 = vmul.f32 %v929_v52, %v602_v28  ;;  %v1757_v4 = vmul.f32 %v929_v52, %v603_v17  ;;  %v876_v25 = vmul.f32 %v857_v16, %v1709_v9 }
 0x28b   :  { %1225 = vpow2.f32 %v896_v51  ;;  %v900_v34 = vmul.f32 1.442695, %v877_v10  ;;  %v930_v35 = vperm.slane %v922_v2, 0  ;;  %v858_v3 = vperm.slane %v850_v41, 0 }
 0x28c   :  { %v1216_v50 = vpop.eup %1215  ;;  %v898_v36 = vmul.f32 1.442695, %v876_v25  ;;  %v923_v1 = vrot.slane %v1730_v49, 4  ;;  %v859_v11 = vperm.slane %v851_v46, 0  ;;  %v860_v56 = vperm.slane %v852_v48, 0 }
 0x28d   :  { %v1218_v43 = vpop.eup %1217  ;;  %v959_v5 = vmul.f32 0.0, %v1216_v50  ;;  %1227 = vpow2.f32 %v900_v34  ;;  %v1762_v6 = vmul.f32 %v930_v35, %v1682_v42  ;;  %v1765_v17 = vmul.f32 %v930_v35, %v1701_v12 }
 0x28e   :  { %v1220_v28 = vpop.eup %1219  ;;  %v960_v16 = vmul.f32 0.0, %v1218_v43  ;;  %v750_v37 = vpop.permute.xlu2 %749  ;;  %1229 = vpow2.f32 %v898_v36  ;;  %v879_v41 = vmul.f32 %v858_v3, %v1711_v61  ;;  %v931_v15 = vperm.slane %v923_v1, 0 }
 0x28f   :  { %v743_v62 = vpop.permute.xlu1 %742  ;;  %v1222_v47 = vpop.eup %1221  ;;  %v961_v46 = vadd.f32 %v959_v5, %v943_v13  ;;  %v826_v48 = vsel %vm248_vm1, %v1573_v29, %v750_v37  ;;  %v878_v51 = vmul.f32 %v858_v3, %v1709_v9  ;;  %v880_v25 = vmul.f32 %v859_v11, %v1709_v9 }
 0x290   :  { %v825_v42 = vsel %vm248_vm1, %v1560_v23, %v743_v62  ;;  %v1224_v12 = vpop.eup %1223  ;;  %v962_v52 = vadd.f32 %v960_v16, %v944_v54  ;;  %v904_v10 = vmul.f32 1.442695, %v879_v41  ;;  %v1774_v2 = vmul.f32 %v931_v15, %v1715_v19 }
 0x291   :  { %v1226_v34 = vpop.eup %1225  ;;  %v973_v35 = vmul.f32 %v1220_v28, %v961_v46  ;;  %v963_v13 = vmul.f32 %v961_v46, %v1566_v26  ;;  %v902_v50 = vmul.f32 1.442695, %v878_v51  ;;  %v1779_v29 = vmul.f32 %v931_v15, %v1705_v27 }
 0x292   :  { %v974_v36 = vmul.f32 %v1222_v47, %v962_v52  ;;  %v964_v23 = vmul.f32 %v962_v52, %v823_v33  ;;  %1231 = vpow2.f32 %v904_v10  ;;  %v906_v3 = vmul.f32 1.442695, %v880_v25 }
 0x293   :  { %v1228_v1 = vpop.eup %1227  ;;  %v975_v54 = vadd.f32 %v973_v35, %v945_v58  ;;  %1233 = vpow2.f32 %v902_v50  ;;  %v882_v19 = vmul.f32 %v860_v56, %v1709_v9  ;;  %v924_v43 = vrot.slane %v1730_v49, 5 }
 0x294   :  { %v1230_v5 = vpop.eup %1229  ;;  %v965_v16 = vadd.f32 %v964_v23, %v963_v13  ;;  %v976_v28 = vadd.f32 %v974_v36, %v946_v53  ;;  %1235 = vpow2.f32 %v906_v3  ;;  %v925_v26 = vrot.slane %v1730_v49, 6 }
 0x295   :  { %v977_v27 = vmul.f32 %v975_v54, %v1751_v39  ;;  %v987_v37 = vmul.f32 %v1224_v12, %v975_v54  ;;  %v910_v62 = vmul.f32 1.442695, %v882_v19  ;;  %v932_v33 = vperm.slane %v924_v43, 0 }
 0x296   :  { %v966_v41 = vrot.slane %v965_v16, 4  ;;  %v988_v15 = vmul.f32 %v1226_v34, %v976_v28  ;;  %v978_v47 = vmul.f32 %v976_v28, %v825_v42  ;;  %v1785_v58 = vperm.slane %v925_v26, 0 }
 0x297   :  { %v989_v46 = vadd.f32 %v987_v37, %v947_v0  ;;  %1237 = vpow2.f32 %v910_v62  ;;  %v953_v51 = vmul.f32 %v932_v33, %v1651_v55  ;;  %v881_v52 = vmul.f32 %v859_v11, %v1711_v61 }
 0x298   :  { %v1232_v53 = vpop.eup %1231  ;;  %v967_v10 = vadd.f32 %v966_v41, %v965_v16  ;;  %v990_v25 = vadd.f32 %v988_v15, %v1757_v4  ;;  %v979_v35 = vadd.f32 %v978_v47, %v977_v27  ;;  %v1792_v39 = vmul.f32 %v1785_v58, %v1690_v60 }
 0x299   :  { %v1234_v12 = vpop.eup %1233  ;;  %v991_v34 = vmul.f32 %v989_v46, %v826_v48  ;;  %v1001_v42 = vmul.f32 %v1230_v5, %v989_v46  ;;  %v883_v13 = vmul.f32 %v860_v56, %v1711_v61  ;;  %v908_v0 = vmul.f32 1.442695, %v881_v52 }
 0x29a   :  { %v1236_v50 = vpop.eup %1235  ;;  %v968_v36 = vrot.slane %v967_v10, 2  ;;  %v992_v55 = vmul.f32 %v990_v25, %v1686_v22  ;;  %v980_v11 = vrot.slane %v979_v35, 4  ;;  %v1002_v23 = vmul.f32 %v1228_v1, %v990_v25 }
 0x29b   :  { %v1003_v3 = vadd.f32 %v1001_v42, %v1765_v17  ;;  %1239 = vpow2.f32 %v908_v0  ;;  %v912_v4 = vmul.f32 1.442695, %v883_v13  ;;  %v954_v54 = vmul.f32 %v932_v33, %v1719_v63 }
 0x29c   :  { %v969_v60 = vadd.f32 %v968_v36, %v967_v10  ;;  %v993_v19 = vadd.f32 %v992_v55, %v991_v34  ;;  %v981_v43 = vadd.f32 %v980_v11, %v979_v35  ;;  %v1004_v48 = vadd.f32 %v1002_v23, %v1762_v6 }
 0x29d   :  { %v1238_v5 = vpop.eup %1237  ;;  %v1015_v56 = vmul.f32 %v1234_v12, %v1003_v3  ;;  %1241 = vpow2.f32 %v912_v4  ;;  %v853_v16 = vrot.slane %v1726_v21, 7  ;;  %v926_v22 = vrot.slane %v1730_v49, 7 }
 0x29e   :  { %v970_v28 = vrot.slane %v969_v60, 1  ;;  %v994_v1 = vrot.slane %v993_v19, 4  ;;  %v982_v26 = vrot.slane %v981_v43, 2  ;;  %v769_v17 = vpop.permute.xlu2 %768  ;;  %v763_v27 = vpop.permute.xlu1 %762  ;;  %v1016_v37 = vmul.f32 %v1232_v53, %v1004_v48 }
 0x29f   :  { %v829_v63 = vsel %vm248_vm1, %v1581_v32, %v769_v17  ;;  %v828_v62 = vsel %vm248_vm1, %v1554_v18, %v763_v27  ;;  %v1017_v6 = vadd.f32 %v1015_v56, %v1779_v29  ;;  %v861_v33 = vperm.slane %v853_v16, 0 }
 0x2a0   :  { %v971_v41 = vadd.f32 %v970_v28, %v969_v60  ;;  %v995_v15 = vadd.f32 %v994_v1, %v993_v19  ;;  %v983_v21 = vadd.f32 %v982_v26, %v981_v43  ;;  %v1006_v47 = vmul.f32 %v1004_v48, %v829_v63  ;;  %v1114_v48 = vld [vmem:[%s1919_s11 + $0x78] sm:$0xff] }
 0x2a1   :  { %v1240_v49 = vpop.eup %1239  ;;  %v1005_v46 = vmul.f32 %v1003_v3, %v828_v62  ;;  %v1018_v52 = vadd.f32 %v1016_v37, %v1774_v2  ;;  %v1029_v10 = vmul.f32 %v1236_v50, %v1017_v6  ;;  %v884_v53 = vmul.f32 %v861_v33, %v1709_v9  ;;  %1115 = vmatpush.msra.mxu1 %v1114_v48  ;;  %v821_v62 = vpop.permute.xlu0 %820 }
 0x2a2   :  { %972 = vst [vmem:[#allocation2] sm:$0x1] %v971_v41  ;;  %v996_v25 = vrot.slane %v995_v15, 2  ;;  %v984_v32 = vrot.slane %v983_v21, 1  ;;  %v885_v35 = vmul.f32 %v861_v33, %v1711_v61  ;;  %v934_v18 = vperm.slane %v926_v22, 0  ;;  %v1113_v41 = vld [vmem:[%s1919_s11 + $0x70] sm:$0xff] }
 0x2a3   :  { %v1242_v12 = vpop.eup %1241  ;;  %v1007_v29 = vadd.f32 %v1006_v47, %v1005_v46  ;;  %v1031_v34 = vadd.f32 %v1029_v10, %v953_v51  ;;  %v1030_v42 = vmul.f32 %v1240_v49, %v1018_v52  ;;  %v914_v13 = vmul.f32 1.442695, %v884_v53  ;;  %1116 = vmatpush.msra.mxu1 %v1113_v41  ;;  %v1111_v49 = vld [vmem:[%s1919_s11 + $0x60] sm:$0xff]  ;;  %v1110_v10 = vld [vmem:[%s1919_s11 + $0x58] sm:$0xff] }
 0x2a4   :  { %v997_v0 = vadd.f32 %v996_v25, %v995_v15  ;;  %v985_v36 = vadd.f32 %v984_v32, %v983_v21  ;;  %v916_v55 = vmul.f32 1.442695, %v885_v35  ;;  %v956_v2 = vmul.f32 %v1785_v58, %v1723_v8 }
 0x2a5   :  { %v1008_v50 = vrot.slane %v1007_v29, 4  ;;  %v1043_v11 = vmul.f32 %v1238_v5, %v1031_v34  ;;  %v1032_v9 = vadd.f32 %v1030_v42, %v954_v54  ;;  %v1812_v23 = vmul.f32 %v1031_v34, %v1586_v38 }
 0x2a6   :  { %v1817_v61 = vsel %vm248_vm1, %v1462_v45, %v1542_v14  ;;  %v998_v51 = vrot.slane %v997_v0, 1  ;;  %986 = vst [vmem:[#allocation2 + $0x1] sm:$0x1] %v985_v36  ;;  %v782_v3 = vpop.permute.xlu2 %781  ;;  %v776_v4 = vpop.permute.xlu1 %775  ;;  %1243 = vpow2.f32 %v914_v13  ;;  %v958_v60 = vmul.f32 %v934_v18, %v1667_v59 }
 0x2a7   :  { %v1009_v19 = vadd.f32 %v1008_v50, %v1007_v29  ;;  %v831_v8 = vsel %vm248_vm1, %v1589_v40, %v782_v3  ;;  %v830_v38 = vsel %vm248_vm1, %v1577_v30, %v776_v4  ;;  %v1825_v58 = vadd.f32 %v1043_v11, %v1792_v39  ;;  %v1108_v29 = vld [vmem:[%s1919_s11 + $0x48] sm:$0xff]  ;;  %v1923_v50 = vld [vmem:[#allocation6_spill] sm:$0xff] }
 0x2a8   :  { %v999_v54 = vadd.f32 %v998_v51, %v997_v0  ;;  %v1020_v45 = vmul.f32 %v1018_v52, %v831_v8  ;;  %v1019_v14 = vmul.f32 %v1017_v6, %v830_v38  ;;  %v1044_v43 = vmul.f32 %v1242_v12, %v1032_v9  ;;  %v1106_v0 = vld [vmem:[%s1919_s11 + $0x38] sm:$0xff]  ;;  %v1105_v51 = vld [vmem:[%s1919_s11 + $0x30] sm:$0xff]  ;;  %v1104_v8 = vld [vmem:[%s1919_s11 + $0x28] sm:$0xff] }
 0x2a9   :  { %v1164_v59 = vmul.f32 -1.442695, %v1817_v61  ;;  %v1010_v5 = vrot.slane %v1009_v19, 2  ;;  %1245 = vpow2.f32 %v916_v55  ;;  %v612_v39 = vsel %vm248_vm1, %v1630_v20, %v1707_v31  ;;  %v1112_v20 = vld [vmem:[%s1919_s11 + $0x68] sm:$0xff] }
 0x2aa   :  { %1000 = vst [vmem:[#allocation2 + $0x2] sm:$0x1] %v999_v54  ;;  %v1021_v40 = vadd.f32 %v1020_v45, %v1019_v14  ;;  %v1046_v56 = vadd.f32 %v1044_v43, %v956_v2  ;;  %v957_v1 = vmul.f32 %v934_v18, %v612_v39  ;;  %v837_v47 = vsel %vm248_vm1, %v1610_v7, %v821_v62  ;;  %v1109_v18 = vld [vmem:[%s1919_s11 + $0x50] sm:$0xff]  ;;  %v1103_v43 = vld [vmem:[%s1919_s11 + $0x20] sm:$0xff] }
 0x2ab   :  { %v1011_v30 = vadd.f32 %v1010_v5, %v1009_v19  ;;  %1247 = vpow2.f32 %v1164_v59  ;;  %1117 = vmatpush.msra.mxu1 %v1112_v20  ;;  %v1102_v5 = vld [vmem:[%s1919_s11 + $0x18] sm:$0xff]  ;;  %v1101_v39 = vld [vmem:[%s1919_s11 + $0x10] sm:$0xff] }
 0x2ac   :  { %v1244_v16 = vpop.eup %1243  ;;  %v1022_v22 = vrot.slane %v1021_v40, 4 }
 0x2ad   :  { %v1012_v28 = vrot.slane %v1011_v30, 1  ;;  %v1057_v26 = vmul.f32 %v1244_v16, %v1825_v58  ;;  %1118 = vmatpush.msra.mxu1 %v1111_v49 }
 0x2ae   :  { %v1023_v17 = vadd.f32 %v1022_v22, %v1021_v40 }
 0x2af   :  { %v1246_v27 = vpop.eup %1245  ;;  %v1013_v37 = vadd.f32 %v1012_v28, %v1011_v30  ;;  %v1059_v63 = vadd.f32 %v1057_v26, %v957_v1  ;;  %1119 = vmatpush.msra.mxu1 %v1110_v10  ;;  %v1100_v1 = vld [vmem:[%s1919_s11 + $0x8] sm:$0xff] }
 0x2b0   :  { %v1024_v6 = vrot.slane %v1023_v17, 2  ;;  %v1058_v33 = vmul.f32 %v1246_v27, %v1046_v56 }
 0x2b1   :  { %1014 = vst [vmem:[#allocation2 + $0x3] sm:$0x1] %v1013_v37  ;;  %v1248_v21 = vpop.eup %1247  ;;  %1120 = vmatpush.msra.mxu1 %v1109_v18  ;;  %v1099_v37 = vld [vmem:[%s1919_s11] sm:$0xff] }
 0x2b2   :  { %v1025_v31 = vadd.f32 %v1024_v6, %v1023_v17  ;;  %v1060_v15 = vadd.f32 %v1058_v33, %v958_v60  ;;  %v1849_v53 = vadd.f32 1.0, %v1248_v21 }
 0x2b3   :  { %1121 = vmatpush.msra.mxu1 %v1108_v29 }
 0x2b4   :  { %v1026_v46 = vrot.slane %v1025_v31, 1  ;;  %v1062_v52 = vmul.f32 %v1060_v15, %v837_v47  ;;  %1249 = vrcp.f32 %v1849_v53  ;;  %vm1087_vm7 = vweird.f32 %v1849_v53  ;;  %v1193_v47 = vld [vmem:[%s1918_s10] ss:$0 sm:$0xff] }
 0x2b5   :  { %v1093_v6 = vand.u32 2147483648, %v1849_v53 }
 0x2b6   :  { %v1027_v25 = vadd.f32 %v1026_v46, %v1025_v31  ;;  %v802_v32 = vpop.permute.xlu2 %801  ;;  %v795_v35 = vpop.permute.xlu1 %794  ;;  %v1091_v31 = vand.u32 2147483647, %v1849_v53  ;;  %v1076_v46 = vmul.f32 %v1193_v47, %v1674_v57 }
 0x2b7   :  { %v833_v7 = vsel %vm248_vm1, %v1663_v24, %v795_v35  ;;  %v1107_v24 = vld [vmem:[%s1919_s11 + $0x40] sm:$0xff]  ;;  %v834_v13 = vsel %vm248_vm1, %v1593_v44, %v802_v32  ;;  %v1094_v15 = vor.u32 1.1754944e-38, %v1093_v6 }
 0x2b8   :  { %1028 = vst [vmem:[#allocation2 + $0x4] sm:$0x1] %v1027_v25  ;;  %v1034_v12 = vmul.f32 %v1032_v9, %v833_v7  ;;  %1122 = vmatpush.msra.mxu1 %v1107_v24  ;;  %v1924_v9 = vld [vmem:[#allocation7_spill] sm:$0xff]  ;;  %v1047_v44 = vmul.f32 %v1825_v58, %v834_v13  ;;  %vm1092_vm10 = vcmp.eq.f32.partialorder %v1091_v31, 8.507059e+37 }
 0x2ba   :  { %v1035_v34 = vadd.f32 %v1034_v12, %v1812_v23  ;;  %v1250_v3 = vpop.eup %1249  ;;  %1123 = vmatpush.msra.mxu1 %v1106_v0 }
 0x2bb   :  { %v1083_v14 = vmul.f32 %v1250_v3, %v1849_v53  ;;  %vm1088_vm8 = vweird.f32 %v1250_v3 }
 0x2bc   :  { %v1036_v42 = vrot.slane %v1035_v34, 4  ;;  %1124 = vmatpush.msra.mxu1 %v1105_v51  ;;  %vm1089_vm9 = vmor %vm1087_vm7, %vm1088_vm8 }
 0x2bd   :  { %v1084_v16 = vsub.f32 1.0, %v1083_v14 }
 0x2be   :  { %v1037_v36 = vadd.f32 %v1036_v42, %v1035_v34  ;;  %v815_v55 = vpop.permute.xlu2 %814  ;;  %v808_v2 = vpop.permute.xlu1 %807  ;;  %1125 = vmatpush.msra.mxu1 %v1104_v8 }
 0x2bf   :  { %v836_v11 = vsel %vm248_vm1, %v1923_v50, %v815_v55  ;;  %v835_v23 = vsel %vm248_vm1, %v1924_v9, %v808_v2  ;;  %v1085_v27 = vmul.f32 %v1250_v3, %v1084_v16 }
 0x2c0   :  { %v1038_v4 = vrot.slane %v1037_v36, 2  ;;  %v1061_v60 = vmul.f32 %v1059_v63, %v836_v11  ;;  %v1048_v19 = vmul.f32 %v1046_v56, %v835_v23  ;;  %1126 = vmatpush.msra.mxu1 %v1103_v43 }
 0x2c1   :  { %v1086_v20 = vadd.f32 %v1250_v3, %v1085_v27 }
 0x2c2   :  { %v1039_v38 = vadd.f32 %v1038_v4, %v1037_v36  ;;  %v1063_v54 = vadd.f32 %v1062_v52, %v1061_v60  ;;  %v1049_v45 = vadd.f32 %v1048_v19, %v1047_v44  ;;  %1127 = vmatpush.msra.mxu1 %v1102_v5 }
 0x2c3   :  { %v1090_v21 = vsel %vm1089_vm9, %v1250_v3, %v1086_v20 }
 0x2c4   :  { %v1040_v48 = vrot.slane %v1039_v38, 1  ;;  %v1064_v58 = vrot.slane %v1063_v54, 4  ;;  %v1050_v59 = vrot.slane %v1049_v45, 4  ;;  %1128 = vmatpush.msra.mxu1 %v1101_v39  ;;  %v1095_v49 = vsel %vm1092_vm10, %v1094_v15, %v1090_v21 }
 0x2c5   :  { %v1097_v10 = vmul.f32 %v1095_v49, %v1817_v61 }
 0x2c6   :  { %v1041_v40 = vadd.f32 %v1040_v48, %v1039_v38  ;;  %v1065_v56 = vadd.f32 %v1064_v58, %v1063_v54  ;;  %v1051_v30 = vadd.f32 %v1050_v59, %v1049_v45  ;;  %1129 = vmatpush.msra.mxu1 %v1100_v1 }
 0x2c8   :  { %1042 = vst [vmem:[#allocation2 + $0x5] sm:$0x1] %v1041_v40  ;;  %v1066_v22 = vrot.slane %v1065_v56, 2  ;;  %v1052_v28 = vrot.slane %v1051_v30, 2  ;;  %1130 = vmatpush.msra.mxu1 %v1099_v37 }
 0x2ca   :  { %v1067_v26 = vadd.f32 %v1066_v22, %v1065_v56  ;;  %v1053_v17 = vadd.f32 %v1052_v28, %v1051_v30 }
 0x2cc   :  { %v1068_v63 = vrot.slane %v1067_v26, 1  ;;  %v1054_v62 = vrot.slane %v1053_v17, 1 }
 0x2ce   :  { %v1069_v33 = vadd.f32 %v1068_v63, %v1067_v26  ;;  %v1055_v41 = vadd.f32 %v1054_v62, %v1053_v17 }
 0x2d0   :  { %1070 = vst [vmem:[#allocation2 + $0x7] sm:$0x1] %v1069_v33 }
 0x2d1   :  { %1056 = vst [vmem:[#allocation2 + $0x6] sm:$0x1] %v1055_v41 }
 0x2d8   :  { %v1071_v52 = vld [vmem:[#allocation2] sm:$0xff] }
 0x2d9   :  { %v1077_v25 = vadd.f32 %v1076_v46, %v1071_v52 }
 0x2db   :  { %v1098_v32 = vmul.f32 %v1097_v10, %v1077_v25 }
 0x2dd   :  { %1131 = vmatmul.f32.vlgmr.msra.gmra.mxu1 %v1098_v32 }
 0x35a   :  { %v1132_v53 = vpop.f32.mrf.mxu1 }
 0x35b   :  { %1135 = vst.msk [vmem:[#allocation3] sm:$0xff] %vm248_vm1, %v1132_v53 }
 0x35c   :  { %1146 = dma.vmem_to_hbm [thread:$0]  %s1142_s18, 128, %s1144_s1, [#allocation4]  }
 0x35d   :  { %1275 = dma.done.wait [#allocation4], 128  }
 0x35e   :  { %1276 = vsyncadd [#allocation4], 4294967168 }
 0x35f   :  { %1151 = vsyncpa [#allocation4], 1 }

</bundles_post_ra>
